<compile_context>
chip_gen: v6e
topology: v6e:2x2x1
jax: 0.10.0
libtpu: 0.0.40
codegen_flags: <defaults>
</compile_context>

<pallas_src>
import functools

import numpy as np
import jax
import jax.numpy as jnp
from jax.experimental import pallas as pl
from jax.experimental.pallas import tpu as pltpu

EPS = 1e-5

_CP = pltpu.CompilerParams(
    dimension_semantics=("parallel",),        # sample axis -> megacore-shardable
    vmem_limit_bytes=32 * 1024 * 1024,        # explicit, safe on v5e/v6e/v7x
)


# ----------------------------- spec helpers ---------------------------------
def _sample_spec(*dims):
    """BlockSpec for an (N, *dims) array, one sample per grid step."""
    nd = len(dims)
    return pl.BlockSpec((None,) + tuple(dims), lambda n: (n,) + (0,) * nd)


def _full_spec(shape):
    """BlockSpec for a small array (weights / scale / bias) resident every step."""
    nd = len(shape)
    return pl.BlockSpec(tuple(shape), lambda n: (0,) * nd)


# --------------------------- in-kernel helpers -------------------------------
def _write_stats(st_ref, v):
    """Per-sample channel stats: row 0 = sum, row 1 = sum of squares (f32)."""
    st_ref[pl.ds(0, 1), :] = jnp.sum(v, axis=0, keepdims=True)
    st_ref[pl.ds(1, 1), :] = jnp.sum(v * v, axis=0, keepdims=True)


def _bn_fold(stats, gamma, beta, count):
    """Fold batch stats + affine params into (scale, bias), each (1, C)."""
    tot = jnp.sum(stats, axis=0)                      # (2, C)
    mean = tot[0:1, :] / count
    var = tot[1:2, :] / count - mean * mean           # biased variance
    scale = gamma * jax.lax.rsqrt(var + EPS)
    bias = beta - mean * scale
    return scale, bias


# ------------------------------ kernels --------------------------------------
def make_entry_kernel(L, stride, has_down):
    """conv1 (1x1) + stats; optional downsample conv (1x1, stride) + stats."""
    L_out = (L - 1) // stride + 1

    def kernel(*refs):
        if has_down:
            x_ref, w1_ref, wd_ref, h1_ref, st1_ref, d_ref, std_ref = refs
        else:
            x_ref, w1_ref, h1_ref, st1_ref = refs
        x = x_ref[...]                                    # (L, Cin) f32
        xb = x.astype(jnp.bfloat16)
        h1 = jnp.dot(xb, w1_ref[...], preferred_element_type=jnp.float32)
        h1_ref[...] = h1
        _write_stats(st1_ref, h1)
        if has_down:
            if stride > 1:
                # stride applied before the matmul: strided row read of x
                xs = x_ref[pl.ds(0, L_out, stride), :].astype(jnp.bfloat16)
            else:
                xs = xb
            d = jnp.dot(xs, wd_ref[...], preferred_element_type=jnp.float32)
            d_ref[...] = d
            _write_stats(std_ref, d)

    return kernel


def make_conv2_kernel(L, stride, cm):
    """BN1(scale/bias)+ReLU -> Conv1d(k=3, pad=1, stride) as one wide-K matmul."""
    L_out = (L - 1) // stride + 1

    def sl(off):
        return pl.ds(off, L_out, stride) if stride > 1 else pl.ds(off, L_out)

    def kernel(h_ref, sc_ref, bi_ref, w2_ref, y_ref, st_ref, pad_ref):
        # folded BN apply (single FMA) + ReLU, f32
        a = jnp.maximum(h_ref[...] * sc_ref[...] + bi_ref[...], 0.0)   # (L, cm)
        # zero-padded activation: pad_ref[j] = a[j-1]; rows 0 and L+1 are padding
        pad_ref[pl.ds(0, 1), :] = jnp.zeros((1, cm), jnp.float32)
        pad_ref[pl.ds(L + 1, 1), :] = jnp.zeros((1, cm), jnp.float32)
        pad_ref[pl.ds(1, L), :] = a
        # three taps at strided output positions (stride applied BEFORE matmul)
        prev = pad_ref[sl(0), :]
        cent = pad_ref[sl(1), :]
        nxt = pad_ref[sl(2), :]
        hcat = jnp.concatenate([prev, cent, nxt], axis=1).astype(jnp.bfloat16)
        y = jnp.dot(hcat, w2_ref[...], preferred_element_type=jnp.float32)
        y_ref[...] = y
        _write_stats(st_ref, y)

    return kernel


def conv3_kernel(y_ref, sc_ref, bi_ref, w3_ref, z_ref, st_ref):
    """BN2(scale/bias)+ReLU -> conv3 (1x1) + stats."""
    a = jnp.maximum(y_ref[...] * sc_ref[...] + bi_ref[...], 0.0)
    z = jnp.dot(a.astype(jnp.bfloat16), w3_ref[...],
                preferred_element_type=jnp.float32)
    z_ref[...] = z
    _write_stats(st_ref, z)


def make_epilogue_kernel(identity_bn, fuse_next):
    """BN3 + (BN'd or plain) identity + ReLU; optionally fused with conv1 of
    the next block (plus that conv1's BN stats)."""

    def kernel(*refs):
        refs = list(refs)
        z_ref = refs.pop(0)
        s3_ref = refs.pop(0)
        b3_ref = refs.pop(0)
        id_ref = refs.pop(0)
        if identity_bn:
            sd_ref = refs.pop(0)
            bd_ref = refs.pop(0)
        if fuse_next:
            w1n_ref = refs.pop(0)
        out_ref = refs.pop(0)
        if fuse_next:
            h1n_ref = refs.pop(0)
            st1n_ref = refs.pop(0)

        z = z_ref[...] * s3_ref[...] + b3_ref[...]
        ident = id_ref[...]
        if identity_bn:
            ident = ident * sd_ref[...] + bd_ref[...]
        out = jnp.maximum(z + ident, 0.0)
        out_ref[...] = out
        if fuse_next:
            h1n = jnp.dot(out.astype(jnp.bfloat16), w1n_ref[...],
                          preferred_element_type=jnp.float32)
            h1n_ref[...] = h1n
            _write_stats(st1n_ref, h1n)

    return kernel


# ------------------------------ call wrappers --------------------------------
def entry_call(x, w1_bf, wd_bf, stride):
    N, L, cin = x.shape
    cm = w1_bf.shape[1]
    L_out = (L - 1) // stride + 1
    has_down = wd_bf is not None

    inputs = [x, w1_bf]
    in_specs = [_sample_spec(L, cin), _full_spec(w1_bf.shape)]
    out_shape = [jax.ShapeDtypeStruct((N, L, cm), jnp.float32),
                 jax.ShapeDtypeStruct((N, 2, cm), jnp.float32)]
    out_specs = [_sample_spec(L, cm), _sample_spec(2, cm)]
    if has_down:
        cout = wd_bf.shape[1]
        inputs.append(wd_bf)
        in_specs.append(_full_spec(wd_bf.shape))
        out_shape += [jax.ShapeDtypeStruct((N, L_out, cout), jnp.float32),
                      jax.ShapeDtypeStruct((N, 2, cout), jnp.float32)]
        out_specs += [_sample_spec(L_out, cout), _sample_spec(2, cout)]

    res = pl.pallas_call(
        make_entry_kernel(L, stride, has_down),
        grid=(N,),
        out_shape=tuple(out_shape),
        in_specs=in_specs,
        out_specs=tuple(out_specs),
        compiler_params=_CP,
    )(*inputs)
    if has_down:
        return res                       # h1, st1, d, std
    h1, st1 = res
    return h1, st1, None, None


def conv2_call(h1, scale, bias, w2_bf, L, stride):
    N, _, cm = h1.shape
    L_out = (L - 1) // stride + 1
    return pl.pallas_call(
        make_conv2_kernel(L, stride, cm),
        grid=(N,),
        out_shape=(jax.ShapeDtypeStruct((N, L_out, cm), jnp.float32),
                   jax.ShapeDtypeStruct((N, 2, cm), jnp.float32)),
        in_specs=[_sample_spec(L, cm), _full_spec(scale.shape),
                  _full_spec(bias.shape), _full_spec(w2_bf.shape)],
        out_specs=(_sample_spec(L_out, cm), _sample_spec(2, cm)),
        scratch_shapes=[pltpu.VMEM((L + 2, cm), jnp.float32)],
        compiler_params=_CP,
    )(h1, scale, bias, w2_bf)


def conv3_call(y, scale, bias, w3_bf):
    N, Lc, cm = y.shape
    cout = w3_bf.shape[1]
    return pl.pallas_call(
        conv3_kernel,
        grid=(N,),
        out_shape=(jax.ShapeDtypeStruct((N, Lc, cout), jnp.float32),
                   jax.ShapeDtypeStruct((N, 2, cout), jnp.float32)),
        in_specs=[_sample_spec(Lc, cm), _full_spec(scale.shape),
                  _full_spec(bias.shape), _full_spec(w3_bf.shape)],
        out_specs=(_sample_spec(Lc, cout), _sample_spec(2, cout)),
        compiler_params=_CP,
    )(y, scale, bias, w3_bf)


def epilogue_call(z, s3, b3, ident, sd=None, bd=None, w1n_bf=None):
    N, Lc, cout = z.shape
    identity_bn = sd is not None
    fuse = w1n_bf is not None

    inputs = [z, s3, b3, ident]
    in_specs = [_sample_spec(Lc, cout), _full_spec(s3.shape),
                _full_spec(b3.shape), _sample_spec(Lc, cout)]
    if identity_bn:
        inputs += [sd, bd]
        in_specs += [_full_spec(sd.shape), _full_spec(bd.shape)]
    out_shape = [jax.ShapeDtypeStruct((N, Lc, cout), jnp.float32)]
    out_specs = [_sample_spec(Lc, cout)]
    if fuse:
        cm_next = w1n_bf.shape[1]
        inputs.append(w1n_bf)
        in_specs.append(_full_spec(w1n_bf.shape))
        out_shape += [jax.ShapeDtypeStruct((N, Lc, cm_next), jnp.float32),
                      jax.ShapeDtypeStruct((N, 2, cm_next), jnp.float32)]
        out_specs += [_sample_spec(Lc, cm_next), _sample_spec(2, cm_next)]

    res = pl.pallas_call(
        make_epilogue_kernel(identity_bn, fuse),
        grid=(N,),
        out_shape=tuple(out_shape),
        in_specs=in_specs,
        out_specs=tuple(out_specs),
        compiler_params=_CP,
    )(*inputs)
    if fuse:
        return res                        # out, h1_next, st1_next
    return res[0], None, None


# ------------------------------ ResLayer forward -----------------------------
@functools.partial(jax.jit, static_argnums=(2,))
def res_layer_pallas(x_ncl, params, first_stride):
    N, _, L = x_ncl.shape
    x = jnp.transpose(x_ncl, (0, 2, 1))             # (N, L, Cin), channels-last

    n_blocks = len(params)
    cur_in = x
    cur_L = L
    h1 = st1 = d = std = None

    for bi, blk in enumerate(params):
        stride = first_stride if bi == 0 else 1
        L_out = (cur_L - 1) // stride + 1
        has_down = blk["wd"] is not None
        # TODO(synk): identity path with stride>1 and no downsample conv is not
        # supported (the torch module would also fail to add mismatched shapes).
        assert has_down or stride == 1

        w2_bf = blk["w2"].astype(jnp.bfloat16)
        w3_bf = blk["w3"].astype(jnp.bfloat16)

        # conv1 (+ downsample) + stats: block 0 from raw x, later blocks were
        # already produced by the previous block's fused epilogue.
        if bi == 0:
            w1_bf = blk["w1"].astype(jnp.bfloat16)
            wd_bf = blk["wd"].astype(jnp.bfloat16) if has_down else None
            h1, st1, d, std = entry_call(x, w1_bf, wd_bf, stride)

        s1, b1 = _bn_fold(st1, blk["g1"], blk["b1"], N * cur_L)

        # conv2 (k=3, pad=1, stride applied before the matmul)
        y, st2 = conv2_call(h1, s1, b1, w2_bf, cur_L, stride)
        s2, b2 = _bn_fold(st2, blk["g2"], blk["b2"], N * L_out)

        # conv3 (1x1)
        z, st3 = conv3_call(y, s2, b2, w3_bf)
        s3, b3 = _bn_fold(st3, blk["g3"], blk["b3"], N * L_out)

        # bn3 + identity + relu (+ fused conv1/stats of the next block)
        if has_down:
            sdv, bdv = _bn_fold(std, blk["gd"], blk["bd"], N * L_out)
            ident, sid, bid = d, sdv, bdv
        else:
            ident, sid, bid = cur_in, None, None

        if bi + 1 < n_blocks:
            w1n_bf = params[bi + 1]["w1"].astype(jnp.bfloat16)
            out, h1, st1 = epilogue_call(z, s3, b3, ident, sid, bid, w1n_bf)
        else:
            out, _, _ = epilogue_call(z, s3, b3, ident, sid, bid, None)

        cur_in = out
        cur_L = L_out

    return jnp.transpose(cur_in, (0, 2, 1))          # back to (N, C, L)


# ------------------------------ params ---------------------------------------
def _bf16_exact(a):
    # store weights as bf16-representable f32 so the in-kernel bf16 cast is lossless
    return a.astype(jnp.bfloat16).astype(jnp.float32)


def init_params(key, n_blocks, in_channels, channels):
    expansion = 4
    out_channels = channels * expansion
    params = []
    c_in = in_channels
    for _ in range(n_blocks):
        key, k1, k2, k3, kd = jax.random.split(key, 5)
        blk = {
            "w1": _bf16_exact(0.3 * jax.random.normal(k1, (c_in, channels), jnp.float32)),
            # conv2 weight stored as (3*C, C): rows [0:C]=left tap, [C:2C]=center, [2C:3C]=right
            "w2": _bf16_exact(0.3 * jax.random.normal(k2, (3 * channels, channels), jnp.float32)),
            "w3": _bf16_exact(0.3 * jax.random.normal(k3, (channels, out_channels), jnp.float32)),
            "wd": (_bf16_exact(0.3 * jax.random.normal(kd, (c_in, out_channels), jnp.float32))
                   if c_in != out_channels else None),
            "g1": jnp.ones((1, channels), jnp.float32),
            "b1": jnp.zeros((1, channels), jnp.float32),
            "g2": jnp.ones((1, channels), jnp.float32),
            "b2": jnp.zeros((1, channels), jnp.float32),
            "g3": jnp.ones((1, out_channels), jnp.float32),
            "b3": jnp.zeros((1, out_channels), jnp.float32),
            "gd": jnp.ones((1, out_channels), jnp.float32),
            "bd": jnp.zeros((1, out_channels), jnp.float32),
        }
        params.append(blk)
        c_in = out_channels
    return params


# -------------------- pure-JAX reference (NCL, like torch) -------------------
def _bn_ref(x, g, b):
    mean = jnp.mean(x, axis=(0, 2), keepdims=True)
    var = jnp.mean((x - mean) ** 2, axis=(0, 2), keepdims=True)
    return (x - mean) / jnp.sqrt(var + EPS) * g.reshape(1, -1, 1) + b.reshape(1, -1, 1)


def _conv1d_ref(x, w, stride, pad):
    return jax.lax.conv_general_dilated(
        x, w, (stride,), [(pad, pad)], dimension_numbers=("NCH", "OIH", "NCH"))


def _resblock_ref(x, blk, stride):
    cm = blk["w1"].shape[1]
    w1 = blk["w1"].T[:, :, None]
    w2 = jnp.stack([blk["w2"][0:cm].T, blk["w2"][cm:2 * cm].T,
                    blk["w2"][2 * cm:3 * cm].T], axis=-1)
    w3 = blk["w3"].T[:, :, None]
    out = jnp.maximum(_bn_ref(_conv1d_ref(x, w1, 1, 0), blk["g1"], blk["b1"]), 0.0)
    out = jnp.maximum(_bn_ref(_conv1d_ref(out, w2, stride, 1), blk["g2"], blk["b2"]), 0.0)
    out = _bn_ref(_conv1d_ref(out, w3, 1, 0), blk["g3"], blk["b3"])
    if blk["wd"] is not None:
        wd = blk["wd"].T[:, :, None]
        ident = _bn_ref(_conv1d_ref(x, wd, stride, 0), blk["gd"], blk["bd"])
    else:
        ident = x
    return jnp.maximum(out + ident, 0.0)


if __name__ == "__main__":
    N, C_IN, L = 2, 4, 16
    CHANNELS, N_BLOCKS, STRIDE = 4, 2, 2

    key = jax.random.PRNGKey(0)
    kx, kp = jax.random.split(key)
    x = _bf16_exact(jax.random.normal(kx, (N, C_IN, L), jnp.float32))  # torch NCL layout
    params = init_params(kp, N_BLOCKS, C_IN, CHANNELS)

    out = res_layer_pallas(x, params, STRIDE)
    out = jax.block_until_ready(out)

    # cross-check against a plain-JAX reference of the torch forward (f32)
    ref = x
    for bi, blk in enumerate(params):
        ref = _resblock_ref(ref, blk, STRIDE if bi == 0 else 1)

    # bf16 matmul inputs (f32 accumulation) -> slightly looser tolerance
    np.testing.assert_allclose(np.asarray(out), np.asarray(ref),
                               rtol=3e-2, atol=3e-2)
    assert out.shape == (N, CHANNELS * 4, L // STRIDE)

    print("KERNEL_OK")
</pallas_src>

<mosaic_0001>
module attributes {stable_mosaic.version = 11 : i64} {
  func.func @kernel(%arg0: i32, %arg1: memref<1x16x4xf32, #tpu.memory_space<vmem>>, %arg2: memref<4x4xbf16, #tpu.memory_space<vmem>>, %arg3: memref<4x16xbf16, #tpu.memory_space<vmem>>, %arg4: memref<1x16x4xf32, #tpu.memory_space<vmem>>, %arg5: memref<1x2x4xf32, #tpu.memory_space<vmem>>, %arg6: memref<1x8x16xf32, #tpu.memory_space<vmem>>, %arg7: memref<1x2x16xf32, #tpu.memory_space<vmem>>) attributes {dimension_semantics = [#tpu.dimension_semantics<parallel>], iteration_bounds = array<i64: 2>, scalar_prefetch = 0 : i64, scratch_operands = 0 : i64, tpu.core_type = #tpu.core_type<tc>, window_params = [{transform_indices = @transform_0, window_bounds = array<i64: 1, 16, 4>}, {pipeline_mode = #tpu.pipeline_mode<synchronous>, transform_indices = @transform_1, window_bounds = array<i64: 4, 4>}, {pipeline_mode = #tpu.pipeline_mode<synchronous>, transform_indices = @transform_2, window_bounds = array<i64: 4, 16>}, {transform_indices = @transform_3, window_bounds = array<i64: 1, 16, 4>}, {transform_indices = @transform_4, window_bounds = array<i64: 1, 2, 4>}, {transform_indices = @transform_5, window_bounds = array<i64: 1, 8, 16>}, {transform_indices = @transform_6, window_bounds = array<i64: 1, 2, 16>}]} {
    %c0 = arith.constant 0 : index
    %c0_0 = arith.constant 0 : index
    %c0_1 = arith.constant 0 : index
    %0 = vector.load %arg1[%c0, %c0_0, %c0_1] : memref<1x16x4xf32, #tpu.memory_space<vmem>>, vector<1x16x4xf32>
    %1 = vector.shape_cast %0 : vector<1x16x4xf32> to vector<16x4xf32>
    %2 = arith.truncf %1 : vector<16x4xf32> to vector<16x4xbf16>
    %c0_2 = arith.constant 0 : index
    %c0_3 = arith.constant 0 : index
    %3 = vector.load %arg2[%c0_2, %c0_3] : memref<4x4xbf16, #tpu.memory_space<vmem>>, vector<4x4xbf16>
    %cst = arith.constant dense<0.000000e+00> : vector<16x4xf32>
    %4 = tpu.matmul %2, %3, %cst {dimension_numbers = #tpu.dot_dimension_numbers<[1], [0], [0], [1], [0, 0, 1, 1], [], []>} : vector<16x4xbf16>, vector<4x4xbf16>, vector<16x4xf32> -> vector<16x4xf32>
    %c0_4 = arith.constant 0 : index
    %c0_5 = arith.constant 0 : index
    %c0_6 = arith.constant 0 : index
    %5 = vector.load %arg4[%c0_4, %c0_5, %c0_6] : memref<1x16x4xf32, #tpu.memory_space<vmem>>, vector<1x16x4xf32>
    %6 = vector.shape_cast %5 : vector<1x16x4xf32> to vector<16x4xf32>
    %7 = vector.shape_cast %4 : vector<16x4xf32> to vector<1x16x4xf32>
    tpu.vector_store %arg4[%c0_4, %c0_5, %c0_6], %7 {strides = array<i32>} : memref<1x16x4xf32, #tpu.memory_space<vmem>>, vector<1x16x4xf32>,
    %cst_7 = arith.constant dense<0.000000e+00> : vector<4xf32>
    %8 = vector.multi_reduction <add>, %4, %cst_7 [0] : vector<16x4xf32> to vector<4xf32>
    %9 = vector.shape_cast %8 : vector<4xf32> to vector<1x4xf32>
    %c0_8 = arith.constant 0 : index
    %c0_9 = arith.constant 0 : index
    %c0_10 = arith.constant 0 : index
    %10 = vector.load %arg5[%c0_8, %c0_9, %c0_10] : memref<1x2x4xf32, #tpu.memory_space<vmem>>, vector<1x1x4xf32>
    %11 = vector.shape_cast %10 : vector<1x1x4xf32> to vector<1x4xf32>
    %12 = vector.shape_cast %9 : vector<1x4xf32> to vector<1x1x4xf32>
    tpu.vector_store %arg5[%c0_8, %c0_9, %c0_10], %12 {strides = array<i32>} : memref<1x2x4xf32, #tpu.memory_space<vmem>>, vector<1x1x4xf32>,
    %13 = arith.mulf %4, %4 : vector<16x4xf32>
    %cst_11 = arith.constant dense<0.000000e+00> : vector<4xf32>
    %14 = vector.multi_reduction <add>, %13, %cst_11 [0] : vector<16x4xf32> to vector<4xf32>
    %15 = vector.shape_cast %14 : vector<4xf32> to vector<1x4xf32>
    %c0_12 = arith.constant 0 : index
    %c1 = arith.constant 1 : index
    %c0_13 = arith.constant 0 : index
    %16 = vector.load %arg5[%c0_12, %c1, %c0_13] : memref<1x2x4xf32, #tpu.memory_space<vmem>>, vector<1x1x4xf32>
    %17 = vector.shape_cast %16 : vector<1x1x4xf32> to vector<1x4xf32>
    %18 = vector.shape_cast %15 : vector<1x4xf32> to vector<1x1x4xf32>
    tpu.vector_store %arg5[%c0_12, %c1, %c0_13], %18 {strides = array<i32>} : memref<1x2x4xf32, #tpu.memory_space<vmem>>, vector<1x1x4xf32>,
    %c0_14 = arith.constant 0 : index
    %c0_15 = arith.constant 0 : index
    %c0_16 = arith.constant 0 : index
    %19 = tpu.strided_load %arg1[%c0_14, %c0_15, %c0_16] {strides = array<i32: 1, 2, 1>} : memref<1x16x4xf32, #tpu.memory_space<vmem>>, vector<1x8x4xf32>
    %20 = vector.shape_cast %19 : vector<1x8x4xf32> to vector<8x4xf32>
    %21 = arith.truncf %20 : vector<8x4xf32> to vector<8x4xbf16>
    %c0_17 = arith.constant 0 : index
    %c0_18 = arith.constant 0 : index
    %22 = vector.load %arg3[%c0_17, %c0_18] : memref<4x16xbf16, #tpu.memory_space<vmem>>, vector<4x16xbf16>
    %cst_19 = arith.constant dense<0.000000e+00> : vector<8x16xf32>
    %23 = tpu.matmul %21, %22, %cst_19 {dimension_numbers = #tpu.dot_dimension_numbers<[1], [0], [0], [1], [0, 0, 1, 1], [], []>} : vector<8x4xbf16>, vector<4x16xbf16>, vector<8x16xf32> -> vector<8x16xf32>
    %c0_20 = arith.constant 0 : index
    %c0_21 = arith.constant 0 : index
    %c0_22 = arith.constant 0 : index
    %24 = vector.load %arg6[%c0_20, %c0_21, %c0_22] : memref<1x8x16xf32, #tpu.memory_space<vmem>>, vector<1x8x16xf32>
    %25 = vector.shape_cast %24 : vector<1x8x16xf32> to vector<8x16xf32>
    %26 = vector.shape_cast %23 : vector<8x16xf32> to vector<1x8x16xf32>
    tpu.vector_store %arg6[%c0_20, %c0_21, %c0_22], %26 {strides = array<i32>} : memref<1x8x16xf32, #tpu.memory_space<vmem>>, vector<1x8x16xf32>,
    %cst_23 = arith.constant dense<0.000000e+00> : vector<16xf32>
    %27 = vector.multi_reduction <add>, %23, %cst_23 [0] : vector<8x16xf32> to vector<16xf32>
    %28 = vector.shape_cast %27 : vector<16xf32> to vector<1x16xf32>
    %c0_24 = arith.constant 0 : index
    %c0_25 = arith.constant 0 : index
    %c0_26 = arith.constant 0 : index
    %29 = vector.load %arg7[%c0_24, %c0_25, %c0_26] : memref<1x2x16xf32, #tpu.memory_space<vmem>>, vector<1x1x16xf32>
    %30 = vector.shape_cast %29 : vector<1x1x16xf32> to vector<1x16xf32>
    %31 = vector.shape_cast %28 : vector<1x16xf32> to vector<1x1x16xf32>
    tpu.vector_store %arg7[%c0_24, %c0_25, %c0_26], %31 {strides = array<i32>} : memref<1x2x16xf32, #tpu.memory_space<vmem>>, vector<1x1x16xf32>,
    %32 = arith.mulf %23, %23 : vector<8x16xf32>
    %cst_27 = arith.constant dense<0.000000e+00> : vector<16xf32>
    %33 = vector.multi_reduction <add>, %32, %cst_27 [0] : vector<8x16xf32> to vector<16xf32>
    %34 = vector.shape_cast %33 : vector<16xf32> to vector<1x16xf32>
    %c0_28 = arith.constant 0 : index
    %c1_29 = arith.constant 1 : index
    %c0_30 = arith.constant 0 : index
    %35 = vector.load %arg7[%c0_28, %c1_29, %c0_30] : memref<1x2x16xf32, #tpu.memory_space<vmem>>, vector<1x1x16xf32>
    %36 = vector.shape_cast %35 : vector<1x1x16xf32> to vector<1x16xf32>
    %37 = vector.shape_cast %34 : vector<1x16xf32> to vector<1x1x16xf32>
    tpu.vector_store %arg7[%c0_28, %c1_29, %c0_30], %37 {strides = array<i32>} : memref<1x2x16xf32, #tpu.memory_space<vmem>>, vector<1x1x16xf32>,
    return
  }
  func.func @transform_0(%arg0: i32) -> (i32, i32, i32) {
    %c0_i32 = arith.constant 0 : i32
    %c0_i32_0 = arith.constant 0 : i32
    %c0_i32_1 = arith.constant 0 : i32
    return %arg0, %c0_i32, %c0_i32_0 : i32, i32, i32
  }
  func.func @transform_1(%arg0: i32) -> (i32, i32) {
    %c0_i32 = arith.constant 0 : i32
    %c0_i32_0 = arith.constant 0 : i32
    %c0_i32_1 = arith.constant 0 : i32
    return %c0_i32, %c0_i32_0 : i32, i32
  }
  func.func @transform_2(%arg0: i32) -> (i32, i32) {
    %c0_i32 = arith.constant 0 : i32
    %c0_i32_0 = arith.constant 0 : i32
    %c0_i32_1 = arith.constant 0 : i32
    return %c0_i32, %c0_i32_0 : i32, i32
  }
  func.func @transform_3(%arg0: i32) -> (i32, i32, i32) {
    %c0_i32 = arith.constant 0 : i32
    %c0_i32_0 = arith.constant 0 : i32
    %c0_i32_1 = arith.constant 0 : i32
    return %arg0, %c0_i32, %c0_i32_0 : i32, i32, i32
  }
  func.func @transform_4(%arg0: i32) -> (i32, i32, i32) {
    %c0_i32 = arith.constant 0 : i32
    %c0_i32_0 = arith.constant 0 : i32
    %c0_i32_1 = arith.constant 0 : i32
    return %arg0, %c0_i32, %c0_i32_0 : i32, i32, i32
  }
  func.func @transform_5(%arg0: i32) -> (i32, i32, i32) {
    %c0_i32 = arith.constant 0 : i32
    %c0_i32_0 = arith.constant 0 : i32
    %c0_i32_1 = arith.constant 0 : i32
    return %arg0, %c0_i32, %c0_i32_0 : i32, i32, i32
  }
  func.func @transform_6(%arg0: i32) -> (i32, i32, i32) {
    %c0_i32 = arith.constant 0 : i32
    %c0_i32_0 = arith.constant 0 : i32
    %c0_i32_1 = arith.constant 0 : i32
    return %arg0, %c0_i32, %c0_i32_0 : i32, i32, i32
  }
}

module attributes {stable_mosaic.version = 11 : i64} {
  func.func @kernel(%arg0: i32, %arg1: memref<1x16x4xf32, #tpu.memory_space<vmem>>, %arg2: memref<1x4xf32, #tpu.memory_space<vmem>>, %arg3: memref<1x4xf32, #tpu.memory_space<vmem>>, %arg4: memref<12x4xbf16, #tpu.memory_space<vmem>>, %arg5: memref<1x8x4xf32, #tpu.memory_space<vmem>>, %arg6: memref<1x2x4xf32, #tpu.memory_space<vmem>>, %arg7: memref<18x4xf32, #tpu.memory_space<vmem>>) attributes {dimension_semantics = [#tpu.dimension_semantics<parallel>], iteration_bounds = array<i64: 2>, scalar_prefetch = 0 : i64, scratch_operands = 1 : i64, tpu.core_type = #tpu.core_type<tc>, window_params = [{transform_indices = @transform_0, window_bounds = array<i64: 1, 16, 4>}, {pipeline_mode = #tpu.pipeline_mode<synchronous>, transform_indices = @transform_1, window_bounds = array<i64: 1, 4>}, {pipeline_mode = #tpu.pipeline_mode<synchronous>, transform_indices = @transform_2, window_bounds = array<i64: 1, 4>}, {pipeline_mode = #tpu.pipeline_mode<synchronous>, transform_indices = @transform_3, window_bounds = array<i64: 12, 4>}, {transform_indices = @transform_4, window_bounds = array<i64: 1, 8, 4>}, {transform_indices = @transform_5, window_bounds = array<i64: 1, 2, 4>}]} {
    %c0 = arith.constant 0 : index
    %c0_0 = arith.constant 0 : index
    %c0_1 = arith.constant 0 : index
    %0 = vector.load %arg1[%c0, %c0_0, %c0_1] : memref<1x16x4xf32, #tpu.memory_space<vmem>>, vector<1x16x4xf32>
    %1 = vector.shape_cast %0 : vector<1x16x4xf32> to vector<16x4xf32>
    %c0_2 = arith.constant 0 : index
    %c0_3 = arith.constant 0 : index
    %2 = vector.load %arg2[%c0_2, %c0_3] : memref<1x4xf32, #tpu.memory_space<vmem>>, vector<1x4xf32>
    %3 = vector.broadcast %2 : vector<1x4xf32> to vector<16x4xf32>
    %4 = arith.mulf %1, %3 : vector<16x4xf32>
    %c0_4 = arith.constant 0 : index
    %c0_5 = arith.constant 0 : index
    %5 = vector.load %arg3[%c0_4, %c0_5] : memref<1x4xf32, #tpu.memory_space<vmem>>, vector<1x4xf32>
    %6 = vector.broadcast %5 : vector<1x4xf32> to vector<16x4xf32>
    %7 = arith.addf %4, %6 : vector<16x4xf32>
    %cst = arith.constant 0.000000e+00 : f32
    %8 = vector.broadcast %cst : f32 to vector<16x4xf32>
    %9 = arith.maximumf %7, %8 : vector<16x4xf32>
    %cst_6 = arith.constant 0.000000e+00 : f32
    %10 = vector.broadcast %cst_6 : f32 to vector<1x4xf32>
    %c0_7 = arith.constant 0 : index
    %c0_8 = arith.constant 0 : index
    %11 = vector.load %arg7[%c0_7, %c0_8] : memref<18x4xf32, #tpu.memory_space<vmem>>, vector<1x4xf32>
    tpu.vector_store %arg7[%c0_7, %c0_8], %10 {strides = array<i32>} : memref<18x4xf32, #tpu.memory_space<vmem>>, vector<1x4xf32>,
    %cst_9 = arith.constant 0.000000e+00 : f32
    %12 = vector.broadcast %cst_9 : f32 to vector<1x4xf32>
    %c17 = arith.constant 17 : index
    %c0_10 = arith.constant 0 : index
    %13 = vector.load %arg7[%c17, %c0_10] : memref<18x4xf32, #tpu.memory_space<vmem>>, vector<1x4xf32>
    tpu.vector_store %arg7[%c17, %c0_10], %12 {strides = array<i32>} : memref<18x4xf32, #tpu.memory_space<vmem>>, vector<1x4xf32>,
    %c1 = arith.constant 1 : index
    %c0_11 = arith.constant 0 : index
    %14 = vector.load %arg7[%c1, %c0_11] : memref<18x4xf32, #tpu.memory_space<vmem>>, vector<16x4xf32>
    tpu.vector_store %arg7[%c1, %c0_11], %9 {strides = array<i32>} : memref<18x4xf32, #tpu.memory_space<vmem>>, vector<16x4xf32>,
    %c0_12 = arith.constant 0 : index
    %c0_13 = arith.constant 0 : index
    %15 = tpu.strided_load %arg7[%c0_12, %c0_13] {strides = array<i32: 2, 1>} : memref<18x4xf32, #tpu.memory_space<vmem>>, vector<8x4xf32>
    %c1_14 = arith.constant 1 : index
    %c0_15 = arith.constant 0 : index
    %16 = tpu.strided_load %arg7[%c1_14, %c0_15] {strides = array<i32: 2, 1>} : memref<18x4xf32, #tpu.memory_space<vmem>>, vector<8x4xf32>
    %c2 = arith.constant 2 : index
    %c0_16 = arith.constant 0 : index
    %17 = tpu.strided_load %arg7[%c2, %c0_16] {strides = array<i32: 2, 1>} : memref<18x4xf32, #tpu.memory_space<vmem>>, vector<8x4xf32>
    %18 = tpu.concatenate %15, %16, %17 in 1 : vector<8x4xf32>, vector<8x4xf32>, vector<8x4xf32> -> vector<8x12xf32>
    %19 = arith.truncf %18 : vector<8x12xf32> to vector<8x12xbf16>
    %c0_17 = arith.constant 0 : index
    %c0_18 = arith.constant 0 : index
    %20 = vector.load %arg4[%c0_17, %c0_18] : memref<12x4xbf16, #tpu.memory_space<vmem>>, vector<12x4xbf16>
    %cst_19 = arith.constant dense<0.000000e+00> : vector<8x4xf32>
    %21 = tpu.matmul %19, %20, %cst_19 {dimension_numbers = #tpu.dot_dimension_numbers<[1], [0], [0], [1], [0, 0, 1, 1], [], []>} : vector<8x12xbf16>, vector<12x4xbf16>, vector<8x4xf32> -> vector<8x4xf32>
    %c0_20 = arith.constant 0 : index
    %c0_21 = arith.constant 0 : index
    %c0_22 = arith.constant 0 : index
    %22 = vector.load %arg5[%c0_20, %c0_21, %c0_22] : memref<1x8x4xf32, #tpu.memory_space<vmem>>, vector<1x8x4xf32>
    %23 = vector.shape_cast %22 : vector<1x8x4xf32> to vector<8x4xf32>
    %24 = vector.shape_cast %21 : vector<8x4xf32> to vector<1x8x4xf32>
    tpu.vector_store %arg5[%c0_20, %c0_21, %c0_22], %24 {strides = array<i32>} : memref<1x8x4xf32, #tpu.memory_space<vmem>>, vector<1x8x4xf32>,
    %cst_23 = arith.constant dense<0.000000e+00> : vector<4xf32>
    %25 = vector.multi_reduction <add>, %21, %cst_23 [0] : vector<8x4xf32> to vector<4xf32>
    %26 = vector.shape_cast %25 : vector<4xf32> to vector<1x4xf32>
    %c0_24 = arith.constant 0 : index
    %c0_25 = arith.constant 0 : index
    %c0_26 = arith.constant 0 : index
    %27 = vector.load %arg6[%c0_24, %c0_25, %c0_26] : memref<1x2x4xf32, #tpu.memory_space<vmem>>, vector<1x1x4xf32>
    %28 = vector.shape_cast %27 : vector<1x1x4xf32> to vector<1x4xf32>
    %29 = vector.shape_cast %26 : vector<1x4xf32> to vector<1x1x4xf32>
    tpu.vector_store %arg6[%c0_24, %c0_25, %c0_26], %29 {strides = array<i32>} : memref<1x2x4xf32, #tpu.memory_space<vmem>>, vector<1x1x4xf32>,
    %30 = arith.mulf %21, %21 : vector<8x4xf32>
    %cst_27 = arith.constant dense<0.000000e+00> : vector<4xf32>
    %31 = vector.multi_reduction <add>, %30, %cst_27 [0] : vector<8x4xf32> to vector<4xf32>
    %32 = vector.shape_cast %31 : vector<4xf32> to vector<1x4xf32>
    %c0_28 = arith.constant 0 : index
    %c1_29 = arith.constant 1 : index
    %c0_30 = arith.constant 0 : index
    %33 = vector.load %arg6[%c0_28, %c1_29, %c0_30] : memref<1x2x4xf32, #tpu.memory_space<vmem>>, vector<1x1x4xf32>
    %34 = vector.shape_cast %33 : vector<1x1x4xf32> to vector<1x4xf32>
    %35 = vector.shape_cast %32 : vector<1x4xf32> to vector<1x1x4xf32>
    tpu.vector_store %arg6[%c0_28, %c1_29, %c0_30], %35 {strides = array<i32>} : memref<1x2x4xf32, #tpu.memory_space<vmem>>, vector<1x1x4xf32>,
    return
  }
  func.func @transform_0(%arg0: i32) -> (i32, i32, i32) {
    %c0_i32 = arith.constant 0 : i32
    %c0_i32_0 = arith.constant 0 : i32
    %c0_i32_1 = arith.constant 0 : i32
    return %arg0, %c0_i32, %c0_i32_0 : i32, i32, i32
  }
  func.func @transform_1(%arg0: i32) -> (i32, i32) {
    %c0_i32 = arith.constant 0 : i32
    %c0_i32_0 = arith.constant 0 : i32
    %c0_i32_1 = arith.constant 0 : i32
    return %c0_i32, %c0_i32_0 : i32, i32
  }
  func.func @transform_2(%arg0: i32) -> (i32, i32) {
    %c0_i32 = arith.constant 0 : i32
    %c0_i32_0 = arith.constant 0 : i32
    %c0_i32_1 = arith.constant 0 : i32
    return %c0_i32, %c0_i32_0 : i32, i32
  }
  func.func @transform_3(%arg0: i32) -> (i32, i32) {
    %c0_i32 = arith.constant 0 : i32
    %c0_i32_0 = arith.constant 0 : i32
    %c0_i32_1 = arith.constant 0 : i32
    return %c0_i32, %c0_i32_0 : i32, i32
  }
  func.func @transform_4(%arg0: i32) -> (i32, i32, i32) {
    %c0_i32 = arith.constant 0 : i32
    %c0_i32_0 = arith.constant 0 : i32
    %c0_i32_1 = arith.constant 0 : i32
    return %arg0, %c0_i32, %c0_i32_0 : i32, i32, i32
  }
  func.func @transform_5(%arg0: i32) -> (i32, i32, i32) {
    %c0_i32 = arith.constant 0 : i32
    %c0_i32_0 = arith.constant 0 : i32
    %c0_i32_1 = arith.constant 0 : i32
    return %arg0, %c0_i32, %c0_i32_0 : i32, i32, i32
  }
}

module attributes {stable_mosaic.version = 11 : i64} {
  func.func @conv3_kernel(%arg0: i32, %arg1: memref<1x8x4xf32, #tpu.memory_space<vmem>>, %arg2: memref<1x4xf32, #tpu.memory_space<vmem>>, %arg3: memref<1x4xf32, #tpu.memory_space<vmem>>, %arg4: memref<4x16xbf16, #tpu.memory_space<vmem>>, %arg5: memref<1x8x16xf32, #tpu.memory_space<vmem>>, %arg6: memref<1x2x16xf32, #tpu.memory_space<vmem>>) attributes {dimension_semantics = [#tpu.dimension_semantics<parallel>], iteration_bounds = array<i64: 2>, scalar_prefetch = 0 : i64, scratch_operands = 0 : i64, tpu.core_type = #tpu.core_type<tc>, window_params = [{transform_indices = @transform_0, window_bounds = array<i64: 1, 8, 4>}, {pipeline_mode = #tpu.pipeline_mode<synchronous>, transform_indices = @transform_1, window_bounds = array<i64: 1, 4>}, {pipeline_mode = #tpu.pipeline_mode<synchronous>, transform_indices = @transform_2, window_bounds = array<i64: 1, 4>}, {pipeline_mode = #tpu.pipeline_mode<synchronous>, transform_indices = @transform_3, window_bounds = array<i64: 4, 16>}, {transform_indices = @transform_4, window_bounds = array<i64: 1, 8, 16>}, {transform_indices = @transform_5, window_bounds = array<i64: 1, 2, 16>}]} {
    %c0 = arith.constant 0 : index
    %c0_0 = arith.constant 0 : index
    %c0_1 = arith.constant 0 : index
    %0 = vector.load %arg1[%c0, %c0_0, %c0_1] : memref<1x8x4xf32, #tpu.memory_space<vmem>>, vector<1x8x4xf32>
    %1 = vector.shape_cast %0 : vector<1x8x4xf32> to vector<8x4xf32>
    %c0_2 = arith.constant 0 : index
    %c0_3 = arith.constant 0 : index
    %2 = vector.load %arg2[%c0_2, %c0_3] : memref<1x4xf32, #tpu.memory_space<vmem>>, vector<1x4xf32>
    %3 = vector.broadcast %2 : vector<1x4xf32> to vector<8x4xf32>
    %4 = arith.mulf %1, %3 : vector<8x4xf32>
    %c0_4 = arith.constant 0 : index
    %c0_5 = arith.constant 0 : index
    %5 = vector.load %arg3[%c0_4, %c0_5] : memref<1x4xf32, #tpu.memory_space<vmem>>, vector<1x4xf32>
    %6 = vector.broadcast %5 : vector<1x4xf32> to vector<8x4xf32>
    %7 = arith.addf %4, %6 : vector<8x4xf32>
    %cst = arith.constant 0.000000e+00 : f32
    %8 = vector.broadcast %cst : f32 to vector<8x4xf32>
    %9 = arith.maximumf %7, %8 : vector<8x4xf32>
    %10 = arith.truncf %9 : vector<8x4xf32> to vector<8x4xbf16>
    %c0_6 = arith.constant 0 : index
    %c0_7 = arith.constant 0 : index
    %11 = vector.load %arg4[%c0_6, %c0_7] : memref<4x16xbf16, #tpu.memory_space<vmem>>, vector<4x16xbf16>
    %cst_8 = arith.constant dense<0.000000e+00> : vector<8x16xf32>
    %12 = tpu.matmul %10, %11, %cst_8 {dimension_numbers = #tpu.dot_dimension_numbers<[1], [0], [0], [1], [0, 0, 1, 1], [], []>} : vector<8x4xbf16>, vector<4x16xbf16>, vector<8x16xf32> -> vector<8x16xf32>
    %c0_9 = arith.constant 0 : index
    %c0_10 = arith.constant 0 : index
    %c0_11 = arith.constant 0 : index
    %13 = vector.load %arg5[%c0_9, %c0_10, %c0_11] : memref<1x8x16xf32, #tpu.memory_space<vmem>>, vector<1x8x16xf32>
    %14 = vector.shape_cast %13 : vector<1x8x16xf32> to vector<8x16xf32>
    %15 = vector.shape_cast %12 : vector<8x16xf32> to vector<1x8x16xf32>
    tpu.vector_store %arg5[%c0_9, %c0_10, %c0_11], %15 {strides = array<i32>} : memref<1x8x16xf32, #tpu.memory_space<vmem>>, vector<1x8x16xf32>,
    %cst_12 = arith.constant dense<0.000000e+00> : vector<16xf32>
    %16 = vector.multi_reduction <add>, %12, %cst_12 [0] : vector<8x16xf32> to vector<16xf32>
    %17 = vector.shape_cast %16 : vector<16xf32> to vector<1x16xf32>
    %c0_13 = arith.constant 0 : index
    %c0_14 = arith.constant 0 : index
    %c0_15 = arith.constant 0 : index
    %18 = vector.load %arg6[%c0_13, %c0_14, %c0_15] : memref<1x2x16xf32, #tpu.memory_space<vmem>>, vector<1x1x16xf32>
    %19 = vector.shape_cast %18 : vector<1x1x16xf32> to vector<1x16xf32>
    %20 = vector.shape_cast %17 : vector<1x16xf32> to vector<1x1x16xf32>
    tpu.vector_store %arg6[%c0_13, %c0_14, %c0_15], %20 {strides = array<i32>} : memref<1x2x16xf32, #tpu.memory_space<vmem>>, vector<1x1x16xf32>,
    %21 = arith.mulf %12, %12 : vector<8x16xf32>
    %cst_16 = arith.constant dense<0.000000e+00> : vector<16xf32>
    %22 = vector.multi_reduction <add>, %21, %cst_16 [0] : vector<8x16xf32> to vector<16xf32>
    %23 = vector.shape_cast %22 : vector<16xf32> to vector<1x16xf32>
    %c0_17 = arith.constant 0 : index
    %c1 = arith.constant 1 : index
    %c0_18 = arith.constant 0 : index
    %24 = vector.load %arg6[%c0_17, %c1, %c0_18] : memref<1x2x16xf32, #tpu.memory_space<vmem>>, vector<1x1x16xf32>
    %25 = vector.shape_cast %24 : vector<1x1x16xf32> to vector<1x16xf32>
    %26 = vector.shape_cast %23 : vector<1x16xf32> to vector<1x1x16xf32>
    tpu.vector_store %arg6[%c0_17, %c1, %c0_18], %26 {strides = array<i32>} : memref<1x2x16xf32, #tpu.memory_space<vmem>>, vector<1x1x16xf32>,
    return
  }
  func.func @transform_0(%arg0: i32) -> (i32, i32, i32) {
    %c0_i32 = arith.constant 0 : i32
    %c0_i32_0 = arith.constant 0 : i32
    %c0_i32_1 = arith.constant 0 : i32
    return %arg0, %c0_i32, %c0_i32_0 : i32, i32, i32
  }
  func.func @transform_1(%arg0: i32) -> (i32, i32) {
    %c0_i32 = arith.constant 0 : i32
    %c0_i32_0 = arith.constant 0 : i32
    %c0_i32_1 = arith.constant 0 : i32
    return %c0_i32, %c0_i32_0 : i32, i32
  }
  func.func @transform_2(%arg0: i32) -> (i32, i32) {
    %c0_i32 = arith.constant 0 : i32
    %c0_i32_0 = arith.constant 0 : i32
    %c0_i32_1 = arith.constant 0 : i32
    return %c0_i32, %c0_i32_0 : i32, i32
  }
  func.func @transform_3(%arg0: i32) -> (i32, i32) {
    %c0_i32 = arith.constant 0 : i32
    %c0_i32_0 = arith.constant 0 : i32
    %c0_i32_1 = arith.constant 0 : i32
    return %c0_i32, %c0_i32_0 : i32, i32
  }
  func.func @transform_4(%arg0: i32) -> (i32, i32, i32) {
    %c0_i32 = arith.constant 0 : i32
    %c0_i32_0 = arith.constant 0 : i32
    %c0_i32_1 = arith.constant 0 : i32
    return %arg0, %c0_i32, %c0_i32_0 : i32, i32, i32
  }
  func.func @transform_5(%arg0: i32) -> (i32, i32, i32) {
    %c0_i32 = arith.constant 0 : i32
    %c0_i32_0 = arith.constant 0 : i32
    %c0_i32_1 = arith.constant 0 : i32
    return %arg0, %c0_i32, %c0_i32_0 : i32, i32, i32
  }
}

module attributes {stable_mosaic.version = 11 : i64} {
  func.func @kernel(%arg0: i32, %arg1: memref<1x8x16xf32, #tpu.memory_space<vmem>>, %arg2: memref<1x16xf32, #tpu.memory_space<vmem>>, %arg3: memref<1x16xf32, #tpu.memory_space<vmem>>, %arg4: memref<1x8x16xf32, #tpu.memory_space<vmem>>, %arg5: memref<1x16xf32, #tpu.memory_space<vmem>>, %arg6: memref<1x16xf32, #tpu.memory_space<vmem>>, %arg7: memref<16x4xbf16, #tpu.memory_space<vmem>>, %arg8: memref<1x8x16xf32, #tpu.memory_space<vmem>>, %arg9: memref<1x8x4xf32, #tpu.memory_space<vmem>>, %arg10: memref<1x2x4xf32, #tpu.memory_space<vmem>>) attributes {dimension_semantics = [#tpu.dimension_semantics<parallel>], iteration_bounds = array<i64: 2>, scalar_prefetch = 0 : i64, scratch_operands = 0 : i64, tpu.core_type = #tpu.core_type<tc>, window_params = [{transform_indices = @transform_0, window_bounds = array<i64: 1, 8, 16>}, {pipeline_mode = #tpu.pipeline_mode<synchronous>, transform_indices = @transform_1, window_bounds = array<i64: 1, 16>}, {pipeline_mode = #tpu.pipeline_mode<synchronous>, transform_indices = @transform_2, window_bounds = array<i64: 1, 16>}, {transform_indices = @transform_3, window_bounds = array<i64: 1, 8, 16>}, {pipeline_mode = #tpu.pipeline_mode<synchronous>, transform_indices = @transform_4, window_bounds = array<i64: 1, 16>}, {pipeline_mode = #tpu.pipeline_mode<synchronous>, transform_indices = @transform_5, window_bounds = array<i64: 1, 16>}, {pipeline_mode = #tpu.pipeline_mode<synchronous>, transform_indices = @transform_6, window_bounds = array<i64: 16, 4>}, {transform_indices = @transform_7, window_bounds = array<i64: 1, 8, 16>}, {transform_indices = @transform_8, window_bounds = array<i64: 1, 8, 4>}, {transform_indices = @transform_9, window_bounds = array<i64: 1, 2, 4>}]} {
    %c0 = arith.constant 0 : index
    %c0_0 = arith.constant 0 : index
    %c0_1 = arith.constant 0 : index
    %0 = vector.load %arg1[%c0, %c0_0, %c0_1] : memref<1x8x16xf32, #tpu.memory_space<vmem>>, vector<1x8x16xf32>
    %1 = vector.shape_cast %0 : vector<1x8x16xf32> to vector<8x16xf32>
    %c0_2 = arith.constant 0 : index
    %c0_3 = arith.constant 0 : index
    %2 = vector.load %arg2[%c0_2, %c0_3] : memref<1x16xf32, #tpu.memory_space<vmem>>, vector<1x16xf32>
    %3 = vector.broadcast %2 : vector<1x16xf32> to vector<8x16xf32>
    %4 = arith.mulf %1, %3 : vector<8x16xf32>
    %c0_4 = arith.constant 0 : index
    %c0_5 = arith.constant 0 : index
    %5 = vector.load %arg3[%c0_4, %c0_5] : memref<1x16xf32, #tpu.memory_space<vmem>>, vector<1x16xf32>
    %6 = vector.broadcast %5 : vector<1x16xf32> to vector<8x16xf32>
    %7 = arith.addf %4, %6 : vector<8x16xf32>
    %c0_6 = arith.constant 0 : index
    %c0_7 = arith.constant 0 : index
    %c0_8 = arith.constant 0 : index
    %8 = vector.load %arg4[%c0_6, %c0_7, %c0_8] : memref<1x8x16xf32, #tpu.memory_space<vmem>>, vector<1x8x16xf32>
    %9 = vector.shape_cast %8 : vector<1x8x16xf32> to vector<8x16xf32>
    %c0_9 = arith.constant 0 : index
    %c0_10 = arith.constant 0 : index
    %10 = vector.load %arg5[%c0_9, %c0_10] : memref<1x16xf32, #tpu.memory_space<vmem>>, vector<1x16xf32>
    %11 = vector.broadcast %10 : vector<1x16xf32> to vector<8x16xf32>
    %12 = arith.mulf %9, %11 : vector<8x16xf32>
    %c0_11 = arith.constant 0 : index
    %c0_12 = arith.constant 0 : index
    %13 = vector.load %arg6[%c0_11, %c0_12] : memref<1x16xf32, #tpu.memory_space<vmem>>, vector<1x16xf32>
    %14 = vector.broadcast %13 : vector<1x16xf32> to vector<8x16xf32>
    %15 = arith.addf %12, %14 : vector<8x16xf32>
    %16 = arith.addf %7, %15 : vector<8x16xf32>
    %cst = arith.constant 0.000000e+00 : f32
    %17 = vector.broadcast %cst : f32 to vector<8x16xf32>
    %18 = arith.maximumf %16, %17 : vector<8x16xf32>
    %c0_13 = arith.constant 0 : index
    %c0_14 = arith.constant 0 : index
    %c0_15 = arith.constant 0 : index
    %19 = vector.load %arg8[%c0_13, %c0_14, %c0_15] : memref<1x8x16xf32, #tpu.memory_space<vmem>>, vector<1x8x16xf32>
    %20 = vector.shape_cast %19 : vector<1x8x16xf32> to vector<8x16xf32>
    %21 = vector.shape_cast %18 : vector<8x16xf32> to vector<1x8x16xf32>
    tpu.vector_store %arg8[%c0_13, %c0_14, %c0_15], %21 {strides = array<i32>} : memref<1x8x16xf32, #tpu.memory_space<vmem>>, vector<1x8x16xf32>,
    %22 = arith.truncf %18 : vector<8x16xf32> to vector<8x16xbf16>
    %c0_16 = arith.constant 0 : index
    %c0_17 = arith.constant 0 : index
    %23 = vector.load %arg7[%c0_16, %c0_17] : memref<16x4xbf16, #tpu.memory_space<vmem>>, vector<16x4xbf16>
    %cst_18 = arith.constant dense<0.000000e+00> : vector<8x4xf32>
    %24 = tpu.matmul %22, %23, %cst_18 {dimension_numbers = #tpu.dot_dimension_numbers<[1], [0], [0], [1], [0, 0, 1, 1], [], []>} : vector<8x16xbf16>, vector<16x4xbf16>, vector<8x4xf32> -> vector<8x4xf32>
    %c0_19 = arith.constant 0 : index
    %c0_20 = arith.constant 0 : index
    %c0_21 = arith.constant 0 : index
    %25 = vector.load %arg9[%c0_19, %c0_20, %c0_21] : memref<1x8x4xf32, #tpu.memory_space<vmem>>, vector<1x8x4xf32>
    %26 = vector.shape_cast %25 : vector<1x8x4xf32> to vector<8x4xf32>
    %27 = vector.shape_cast %24 : vector<8x4xf32> to vector<1x8x4xf32>
    tpu.vector_store %arg9[%c0_19, %c0_20, %c0_21], %27 {strides = array<i32>} : memref<1x8x4xf32, #tpu.memory_space<vmem>>, vector<1x8x4xf32>,
    %cst_22 = arith.constant dense<0.000000e+00> : vector<4xf32>
    %28 = vector.multi_reduction <add>, %24, %cst_22 [0] : vector<8x4xf32> to vector<4xf32>
    %29 = vector.shape_cast %28 : vector<4xf32> to vector<1x4xf32>
    %c0_23 = arith.constant 0 : index
    %c0_24 = arith.constant 0 : index
    %c0_25 = arith.constant 0 : index
    %30 = vector.load %arg10[%c0_23, %c0_24, %c0_25] : memref<1x2x4xf32, #tpu.memory_space<vmem>>, vector<1x1x4xf32>
    %31 = vector.shape_cast %30 : vector<1x1x4xf32> to vector<1x4xf32>
    %32 = vector.shape_cast %29 : vector<1x4xf32> to vector<1x1x4xf32>
    tpu.vector_store %arg10[%c0_23, %c0_24, %c0_25], %32 {strides = array<i32>} : memref<1x2x4xf32, #tpu.memory_space<vmem>>, vector<1x1x4xf32>,
    %33 = arith.mulf %24, %24 : vector<8x4xf32>
    %cst_26 = arith.constant dense<0.000000e+00> : vector<4xf32>
    %34 = vector.multi_reduction <add>, %33, %cst_26 [0] : vector<8x4xf32> to vector<4xf32>
    %35 = vector.shape_cast %34 : vector<4xf32> to vector<1x4xf32>
    %c0_27 = arith.constant 0 : index
    %c1 = arith.constant 1 : index
    %c0_28 = arith.constant 0 : index
    %36 = vector.load %arg10[%c0_27, %c1, %c0_28] : memref<1x2x4xf32, #tpu.memory_space<vmem>>, vector<1x1x4xf32>
    %37 = vector.shape_cast %36 : vector<1x1x4xf32> to vector<1x4xf32>
    %38 = vector.shape_cast %35 : vector<1x4xf32> to vector<1x1x4xf32>
    tpu.vector_store %arg10[%c0_27, %c1, %c0_28], %38 {strides = array<i32>} : memref<1x2x4xf32, #tpu.memory_space<vmem>>, vector<1x1x4xf32>,
    return
  }
  func.func @transform_0(%arg0: i32) -> (i32, i32, i32) {
    %c0_i32 = arith.constant 0 : i32
    %c0_i32_0 = arith.constant 0 : i32
    %c0_i32_1 = arith.constant 0 : i32
    return %arg0, %c0_i32, %c0_i32_0 : i32, i32, i32
  }
  func.func @transform_1(%arg0: i32) -> (i32, i32) {
    %c0_i32 = arith.constant 0 : i32
    %c0_i32_0 = arith.constant 0 : i32
    %c0_i32_1 = arith.constant 0 : i32
    return %c0_i32, %c0_i32_0 : i32, i32
  }
  func.func @transform_2(%arg0: i32) -> (i32, i32) {
    %c0_i32 = arith.constant 0 : i32
    %c0_i32_0 = arith.constant 0 : i32
    %c0_i32_1 = arith.constant 0 : i32
    return %c0_i32, %c0_i32_0 : i32, i32
  }
  func.func @transform_3(%arg0: i32) -> (i32, i32, i32) {
    %c0_i32 = arith.constant 0 : i32
    %c0_i32_0 = arith.constant 0 : i32
    %c0_i32_1 = arith.constant 0 : i32
    return %arg0, %c0_i32, %c0_i32_0 : i32, i32, i32
  }
  func.func @transform_4(%arg0: i32) -> (i32, i32) {
    %c0_i32 = arith.constant 0 : i32
    %c0_i32_0 = arith.constant 0 : i32
    %c0_i32_1 = arith.constant 0 : i32
    return %c0_i32, %c0_i32_0 : i32, i32
  }
  func.func @transform_5(%arg0: i32) -> (i32, i32) {
    %c0_i32 = arith.constant 0 : i32
    %c0_i32_0 = arith.constant 0 : i32
    %c0_i32_1 = arith.constant 0 : i32
    return %c0_i32, %c0_i32_0 : i32, i32
  }
  func.func @transform_6(%arg0: i32) -> (i32, i32) {
    %c0_i32 = arith.constant 0 : i32
    %c0_i32_0 = arith.constant 0 : i32
    %c0_i32_1 = arith.constant 0 : i32
    return %c0_i32, %c0_i32_0 : i32, i32
  }
  func.func @transform_7(%arg0: i32) -> (i32, i32, i32) {
    %c0_i32 = arith.constant 0 : i32
    %c0_i32_0 = arith.constant 0 : i32
    %c0_i32_1 = arith.constant 0 : i32
    return %arg0, %c0_i32, %c0_i32_0 : i32, i32, i32
  }
  func.func @transform_8(%arg0: i32) -> (i32, i32, i32) {
    %c0_i32 = arith.constant 0 : i32
    %c0_i32_0 = arith.constant 0 : i32
    %c0_i32_1 = arith.constant 0 : i32
    return %arg0, %c0_i32, %c0_i32_0 : i32, i32, i32
  }
  func.func @transform_9(%arg0: i32) -> (i32, i32, i32) {
    %c0_i32 = arith.constant 0 : i32
    %c0_i32_0 = arith.constant 0 : i32
    %c0_i32_1 = arith.constant 0 : i32
    return %arg0, %c0_i32, %c0_i32_0 : i32, i32, i32
  }
}

module attributes {stable_mosaic.version = 11 : i64} {
  func.func @kernel(%arg0: i32, %arg1: memref<1x8x4xf32, #tpu.memory_space<vmem>>, %arg2: memref<1x4xf32, #tpu.memory_space<vmem>>, %arg3: memref<1x4xf32, #tpu.memory_space<vmem>>, %arg4: memref<12x4xbf16, #tpu.memory_space<vmem>>, %arg5: memref<1x8x4xf32, #tpu.memory_space<vmem>>, %arg6: memref<1x2x4xf32, #tpu.memory_space<vmem>>, %arg7: memref<10x4xf32, #tpu.memory_space<vmem>>) attributes {dimension_semantics = [#tpu.dimension_semantics<parallel>], iteration_bounds = array<i64: 2>, scalar_prefetch = 0 : i64, scratch_operands = 1 : i64, tpu.core_type = #tpu.core_type<tc>, window_params = [{transform_indices = @transform_0, window_bounds = array<i64: 1, 8, 4>}, {pipeline_mode = #tpu.pipeline_mode<synchronous>, transform_indices = @transform_1, window_bounds = array<i64: 1, 4>}, {pipeline_mode = #tpu.pipeline_mode<synchronous>, transform_indices = @transform_2, window_bounds = array<i64: 1, 4>}, {pipeline_mode = #tpu.pipeline_mode<synchronous>, transform_indices = @transform_3, window_bounds = array<i64: 12, 4>}, {transform_indices = @transform_4, window_bounds = array<i64: 1, 8, 4>}, {transform_indices = @transform_5, window_bounds = array<i64: 1, 2, 4>}]} {
    %c0 = arith.constant 0 : index
    %c0_0 = arith.constant 0 : index
    %c0_1 = arith.constant 0 : index
    %0 = vector.load %arg1[%c0, %c0_0, %c0_1] : memref<1x8x4xf32, #tpu.memory_space<vmem>>, vector<1x8x4xf32>
    %1 = vector.shape_cast %0 : vector<1x8x4xf32> to vector<8x4xf32>
    %c0_2 = arith.constant 0 : index
    %c0_3 = arith.constant 0 : index
    %2 = vector.load %arg2[%c0_2, %c0_3] : memref<1x4xf32, #tpu.memory_space<vmem>>, vector<1x4xf32>
    %3 = vector.broadcast %2 : vector<1x4xf32> to vector<8x4xf32>
    %4 = arith.mulf %1, %3 : vector<8x4xf32>
    %c0_4 = arith.constant 0 : index
    %c0_5 = arith.constant 0 : index
    %5 = vector.load %arg3[%c0_4, %c0_5] : memref<1x4xf32, #tpu.memory_space<vmem>>, vector<1x4xf32>
    %6 = vector.broadcast %5 : vector<1x4xf32> to vector<8x4xf32>
    %7 = arith.addf %4, %6 : vector<8x4xf32>
    %cst = arith.constant 0.000000e+00 : f32
    %8 = vector.broadcast %cst : f32 to vector<8x4xf32>
    %9 = arith.maximumf %7, %8 : vector<8x4xf32>
    %cst_6 = arith.constant 0.000000e+00 : f32
    %10 = vector.broadcast %cst_6 : f32 to vector<1x4xf32>
    %c0_7 = arith.constant 0 : index
    %c0_8 = arith.constant 0 : index
    %11 = vector.load %arg7[%c0_7, %c0_8] : memref<10x4xf32, #tpu.memory_space<vmem>>, vector<1x4xf32>
    tpu.vector_store %arg7[%c0_7, %c0_8], %10 {strides = array<i32>} : memref<10x4xf32, #tpu.memory_space<vmem>>, vector<1x4xf32>,
    %cst_9 = arith.constant 0.000000e+00 : f32
    %12 = vector.broadcast %cst_9 : f32 to vector<1x4xf32>
    %c9 = arith.constant 9 : index
    %c0_10 = arith.constant 0 : index
    %13 = vector.load %arg7[%c9, %c0_10] : memref<10x4xf32, #tpu.memory_space<vmem>>, vector<1x4xf32>
    tpu.vector_store %arg7[%c9, %c0_10], %12 {strides = array<i32>} : memref<10x4xf32, #tpu.memory_space<vmem>>, vector<1x4xf32>,
    %c1 = arith.constant 1 : index
    %c0_11 = arith.constant 0 : index
    %14 = vector.load %arg7[%c1, %c0_11] : memref<10x4xf32, #tpu.memory_space<vmem>>, vector<8x4xf32>
    tpu.vector_store %arg7[%c1, %c0_11], %9 {strides = array<i32>} : memref<10x4xf32, #tpu.memory_space<vmem>>, vector<8x4xf32>,
    %c0_12 = arith.constant 0 : index
    %c0_13 = arith.constant 0 : index
    %15 = vector.load %arg7[%c0_12, %c0_13] : memref<10x4xf32, #tpu.memory_space<vmem>>, vector<8x4xf32>
    %c1_14 = arith.constant 1 : index
    %c0_15 = arith.constant 0 : index
    %16 = vector.load %arg7[%c1_14, %c0_15] : memref<10x4xf32, #tpu.memory_space<vmem>>, vector<8x4xf32>
    %c2 = arith.constant 2 : index
    %c0_16 = arith.constant 0 : index
    %17 = vector.load %arg7[%c2, %c0_16] : memref<10x4xf32, #tpu.memory_space<vmem>>, vector<8x4xf32>
    %18 = tpu.concatenate %15, %16, %17 in 1 : vector<8x4xf32>, vector<8x4xf32>, vector<8x4xf32> -> vector<8x12xf32>
    %19 = arith.truncf %18 : vector<8x12xf32> to vector<8x12xbf16>
    %c0_17 = arith.constant 0 : index
    %c0_18 = arith.constant 0 : index
    %20 = vector.load %arg4[%c0_17, %c0_18] : memref<12x4xbf16, #tpu.memory_space<vmem>>, vector<12x4xbf16>
    %cst_19 = arith.constant dense<0.000000e+00> : vector<8x4xf32>
    %21 = tpu.matmul %19, %20, %cst_19 {dimension_numbers = #tpu.dot_dimension_numbers<[1], [0], [0], [1], [0, 0, 1, 1], [], []>} : vector<8x12xbf16>, vector<12x4xbf16>, vector<8x4xf32> -> vector<8x4xf32>
    %c0_20 = arith.constant 0 : index
    %c0_21 = arith.constant 0 : index
    %c0_22 = arith.constant 0 : index
    %22 = vector.load %arg5[%c0_20, %c0_21, %c0_22] : memref<1x8x4xf32, #tpu.memory_space<vmem>>, vector<1x8x4xf32>
    %23 = vector.shape_cast %22 : vector<1x8x4xf32> to vector<8x4xf32>
    %24 = vector.shape_cast %21 : vector<8x4xf32> to vector<1x8x4xf32>
    tpu.vector_store %arg5[%c0_20, %c0_21, %c0_22], %24 {strides = array<i32>} : memref<1x8x4xf32, #tpu.memory_space<vmem>>, vector<1x8x4xf32>,
    %cst_23 = arith.constant dense<0.000000e+00> : vector<4xf32>
    %25 = vector.multi_reduction <add>, %21, %cst_23 [0] : vector<8x4xf32> to vector<4xf32>
    %26 = vector.shape_cast %25 : vector<4xf32> to vector<1x4xf32>
    %c0_24 = arith.constant 0 : index
    %c0_25 = arith.constant 0 : index
    %c0_26 = arith.constant 0 : index
    %27 = vector.load %arg6[%c0_24, %c0_25, %c0_26] : memref<1x2x4xf32, #tpu.memory_space<vmem>>, vector<1x1x4xf32>
    %28 = vector.shape_cast %27 : vector<1x1x4xf32> to vector<1x4xf32>
    %29 = vector.shape_cast %26 : vector<1x4xf32> to vector<1x1x4xf32>
    tpu.vector_store %arg6[%c0_24, %c0_25, %c0_26], %29 {strides = array<i32>} : memref<1x2x4xf32, #tpu.memory_space<vmem>>, vector<1x1x4xf32>,
    %30 = arith.mulf %21, %21 : vector<8x4xf32>
    %cst_27 = arith.constant dense<0.000000e+00> : vector<4xf32>
    %31 = vector.multi_reduction <add>, %30, %cst_27 [0] : vector<8x4xf32> to vector<4xf32>
    %32 = vector.shape_cast %31 : vector<4xf32> to vector<1x4xf32>
    %c0_28 = arith.constant 0 : index
    %c1_29 = arith.constant 1 : index
    %c0_30 = arith.constant 0 : index
    %33 = vector.load %arg6[%c0_28, %c1_29, %c0_30] : memref<1x2x4xf32, #tpu.memory_space<vmem>>, vector<1x1x4xf32>
    %34 = vector.shape_cast %33 : vector<1x1x4xf32> to vector<1x4xf32>
    %35 = vector.shape_cast %32 : vector<1x4xf32> to vector<1x1x4xf32>
    tpu.vector_store %arg6[%c0_28, %c1_29, %c0_30], %35 {strides = array<i32>} : memref<1x2x4xf32, #tpu.memory_space<vmem>>, vector<1x1x4xf32>,
    return
  }
  func.func @transform_0(%arg0: i32) -> (i32, i32, i32) {
    %c0_i32 = arith.constant 0 : i32
    %c0_i32_0 = arith.constant 0 : i32
    %c0_i32_1 = arith.constant 0 : i32
    return %arg0, %c0_i32, %c0_i32_0 : i32, i32, i32
  }
  func.func @transform_1(%arg0: i32) -> (i32, i32) {
    %c0_i32 = arith.constant 0 : i32
    %c0_i32_0 = arith.constant 0 : i32
    %c0_i32_1 = arith.constant 0 : i32
    return %c0_i32, %c0_i32_0 : i32, i32
  }
  func.func @transform_2(%arg0: i32) -> (i32, i32) {
    %c0_i32 = arith.constant 0 : i32
    %c0_i32_0 = arith.constant 0 : i32
    %c0_i32_1 = arith.constant 0 : i32
    return %c0_i32, %c0_i32_0 : i32, i32
  }
  func.func @transform_3(%arg0: i32) -> (i32, i32) {
    %c0_i32 = arith.constant 0 : i32
    %c0_i32_0 = arith.constant 0 : i32
    %c0_i32_1 = arith.constant 0 : i32
    return %c0_i32, %c0_i32_0 : i32, i32
  }
  func.func @transform_4(%arg0: i32) -> (i32, i32, i32) {
    %c0_i32 = arith.constant 0 : i32
    %c0_i32_0 = arith.constant 0 : i32
    %c0_i32_1 = arith.constant 0 : i32
    return %arg0, %c0_i32, %c0_i32_0 : i32, i32, i32
  }
  func.func @transform_5(%arg0: i32) -> (i32, i32, i32) {
    %c0_i32 = arith.constant 0 : i32
    %c0_i32_0 = arith.constant 0 : i32
    %c0_i32_1 = arith.constant 0 : i32
    return %arg0, %c0_i32, %c0_i32_0 : i32, i32, i32
  }
}

module attributes {stable_mosaic.version = 11 : i64} {
  func.func @kernel(%arg0: i32, %arg1: memref<1x8x16xf32, #tpu.memory_space<vmem>>, %arg2: memref<1x16xf32, #tpu.memory_space<vmem>>, %arg3: memref<1x16xf32, #tpu.memory_space<vmem>>, %arg4: memref<1x8x16xf32, #tpu.memory_space<vmem>>, %arg5: memref<1x8x16xf32, #tpu.memory_space<vmem>>) attributes {dimension_semantics = [#tpu.dimension_semantics<parallel>], iteration_bounds = array<i64: 2>, scalar_prefetch = 0 : i64, scratch_operands = 0 : i64, tpu.core_type = #tpu.core_type<tc>, window_params = [{transform_indices = @transform_0, window_bounds = array<i64: 1, 8, 16>}, {pipeline_mode = #tpu.pipeline_mode<synchronous>, transform_indices = @transform_1, window_bounds = array<i64: 1, 16>}, {pipeline_mode = #tpu.pipeline_mode<synchronous>, transform_indices = @transform_2, window_bounds = array<i64: 1, 16>}, {transform_indices = @transform_3, window_bounds = array<i64: 1, 8, 16>}, {transform_indices = @transform_4, window_bounds = array<i64: 1, 8, 16>}]} {
    %c0 = arith.constant 0 : index
    %c0_0 = arith.constant 0 : index
    %c0_1 = arith.constant 0 : index
    %0 = vector.load %arg1[%c0, %c0_0, %c0_1] : memref<1x8x16xf32, #tpu.memory_space<vmem>>, vector<1x8x16xf32>
    %1 = vector.shape_cast %0 : vector<1x8x16xf32> to vector<8x16xf32>
    %c0_2 = arith.constant 0 : index
    %c0_3 = arith.constant 0 : index
    %2 = vector.load %arg2[%c0_2, %c0_3] : memref<1x16xf32, #tpu.memory_space<vmem>>, vector<1x16xf32>
    %3 = vector.broadcast %2 : vector<1x16xf32> to vector<8x16xf32>
    %4 = arith.mulf %1, %3 : vector<8x16xf32>
    %c0_4 = arith.constant 0 : index
    %c0_5 = arith.constant 0 : index
    %5 = vector.load %arg3[%c0_4, %c0_5] : memref<1x16xf32, #tpu.memory_space<vmem>>, vector<1x16xf32>
    %6 = vector.broadcast %5 : vector<1x16xf32> to vector<8x16xf32>
    %7 = arith.addf %4, %6 : vector<8x16xf32>
    %c0_6 = arith.constant 0 : index
    %c0_7 = arith.constant 0 : index
    %c0_8 = arith.constant 0 : index
    %8 = vector.load %arg4[%c0_6, %c0_7, %c0_8] : memref<1x8x16xf32, #tpu.memory_space<vmem>>, vector<1x8x16xf32>
    %9 = vector.shape_cast %8 : vector<1x8x16xf32> to vector<8x16xf32>
    %10 = arith.addf %7, %9 : vector<8x16xf32>
    %cst = arith.constant 0.000000e+00 : f32
    %11 = vector.broadcast %cst : f32 to vector<8x16xf32>
    %12 = arith.maximumf %10, %11 : vector<8x16xf32>
    %c0_9 = arith.constant 0 : index
    %c0_10 = arith.constant 0 : index
    %c0_11 = arith.constant 0 : index
    %13 = vector.load %arg5[%c0_9, %c0_10, %c0_11] : memref<1x8x16xf32, #tpu.memory_space<vmem>>, vector<1x8x16xf32>
    %14 = vector.shape_cast %13 : vector<1x8x16xf32> to vector<8x16xf32>
    %15 = vector.shape_cast %12 : vector<8x16xf32> to vector<1x8x16xf32>
    tpu.vector_store %arg5[%c0_9, %c0_10, %c0_11], %15 {strides = array<i32>} : memref<1x8x16xf32, #tpu.memory_space<vmem>>, vector<1x8x16xf32>,
    return
  }
  func.func @transform_0(%arg0: i32) -> (i32, i32, i32) {
    %c0_i32 = arith.constant 0 : i32
    %c0_i32_0 = arith.constant 0 : i32
    %c0_i32_1 = arith.constant 0 : i32
    return %arg0, %c0_i32, %c0_i32_0 : i32, i32, i32
  }
  func.func @transform_1(%arg0: i32) -> (i32, i32) {
    %c0_i32 = arith.constant 0 : i32
    %c0_i32_0 = arith.constant 0 : i32
    %c0_i32_1 = arith.constant 0 : i32
    return %c0_i32, %c0_i32_0 : i32, i32
  }
  func.func @transform_2(%arg0: i32) -> (i32, i32) {
    %c0_i32 = arith.constant 0 : i32
    %c0_i32_0 = arith.constant 0 : i32
    %c0_i32_1 = arith.constant 0 : i32
    return %c0_i32, %c0_i32_0 : i32, i32
  }
  func.func @transform_3(%arg0: i32) -> (i32, i32, i32) {
    %c0_i32 = arith.constant 0 : i32
    %c0_i32_0 = arith.constant 0 : i32
    %c0_i32_1 = arith.constant 0 : i32
    return %arg0, %c0_i32, %c0_i32_0 : i32, i32, i32
  }
  func.func @transform_4(%arg0: i32) -> (i32, i32, i32) {
    %c0_i32 = arith.constant 0 : i32
    %c0_i32_0 = arith.constant 0 : i32
    %c0_i32_1 = arith.constant 0 : i32
    return %arg0, %c0_i32, %c0_i32_0 : i32, i32, i32
  }
}

</mosaic_0001>

<bundles_post_ra>
// kernel: res_layer_pallas.7
= control target key start
LH: loop header
LB: loop body
LE: loop exit
PB: predicated region body
PF: predicated region fallthrough
CT: control target
= control target key end

     0   :  { %s668_s21 = smov 0   ;;  %s713_s0 = inlined_call_operand.vmem [shape: f32[2,16,4], index: 0, kind: input, shape index: {}]   ;;  %s714_s1 = inlined_call_operand.vmem [shape: bf16[4,4], index: 1, kind: input, shape index: {}]   ;;  %s715_s2 = inlined_call_operand.vmem [shape: bf16[4,16], index: 2, kind: input, shape index: {}]   ;;  %s716_s3 = inlined_call_operand.vmem [shape: f32[2,16,4], index: 3, kind: output, shape index: {0}]   ;;  %s717_s4 = inlined_call_operand.vmem [shape: f32[2,2,4], index: 4, kind: output, shape index: {1}]   ;;  %s718_s5 = inlined_call_operand.vmem [shape: f32[2,8,16], index: 5, kind: output, shape index: {2}]   ;;  %s719_s6 = inlined_call_operand.vmem [shape: f32[2,2,16], index: 6, kind: output, shape index: {3}]  }
   0x1 LB: > { %s579_s22 = sadd.s32 4294967295, %s629_s21   ;;  %p583_p0 = scmp.ge.s32.totalorder %s629_s21, 1  ;;  %s629_s21 = sphi %s668_s21, %s17_s21  }
   0x2   : > { %p219_p1 = scmp.lt.s32.totalorder %s629_s21, 3 }
   0x4   : > { %p220_p2 = pnand %p583_p0, %p219_p1 }
   0x5   : > { %p261_p3 = scmp.lt.s32.totalorder (!%p220_p2), %s579_s22, 1 }
   0x6   : > { %223 = sbr.rel (%p220_p2) target bundleno = 232 (0xe8), region = 32 }
   0xb   : > { %v287_v0 = vld [vmem:[%s714_s1] sm:$0x3]  ;;  %vm292_vm0 = vcmask 1041408   ;;  %v631_v2 = vmov 0.0   ;;  %vm632_vm1 = vmmov 0   ;;  %s721_s22 = smov (!%p261_p3, %s579_s22), 1 }
   0xc   : > { %v364_v1 = vld [vmem:[%s715_s2] sm:$0x3]  ;;  %601 = vmatprep.subr.bf16.mxu0 %v631_v2  ;;  %607 = vmatprep.subr.bf16.mxu1 %v631_v2  ;;  %v294_v3 = vsel %vm292_vm0, %v287_v0, 0  ;;  %s595_s27 = sshll.u32 %s721_s22, 4  ;;  %vm288_vm2 = vcmask 31744   ;;  %s589_s7 = sshll.u32 %s721_s22, 3 }
   0xd   : > { %v369_v4 = vsel %vm292_vm0, %v364_v1, 0  ;;  %602 = vmatpush3.bf16.msra.mxu0 %v294_v3  ;;  %603 = vmatprep.mubr.msk.bf16.mxu0 %vm632_vm1, %v631_v2  ;;  %s265_s30 = scalar_lea.vmem %s713_s0, %s595_s27  ;;  %s270_s10 = scalar_lea.vmem %s716_s3, %s595_s27  ;;  %vm411_vm3 = vcmask 130048   ;;  %vm420_vm4 = vcmask 122880   ;;  %vm348_vm5 = vcmask 24576  }
   0xe   : > { %608 = vmatpush3.bf16.msra.mxu1 %v369_v4  ;;  %609 = vmatprep.mubr.msk.bf16.mxu1 %vm632_vm1, %v631_v2  ;;  %v284_v5 = vld [vmem:[%s265_s30] sm:$0xff]  ;;  %v285_v6 = vld [vmem:[%s265_s30 + $0x8] sm:$0xff]  ;;  %s278_s13 = scalar_lea.vmem %s718_s5, %s589_s7  ;;  %s588_s14 = sshll.u32 %s721_s22, 1 }
   0xf   : > { %v362_v7 = vld [vmem:[%s265_s30] ss:$2 sm:$0xff]  ;;  %v286_v8 = vpack.c.bf16 %v285_v6, %v284_v5  ;;  %s282_s17 = scalar_lea.vmem %s719_s6, %s588_s14  ;;  %s274_s20 = scalar_lea.vmem %s717_s4, %s588_s14 }
  0x10   : > { %v363_v9 = vpack.c.bf16 %v362_v7, %v362_v7 }
  0x11   : > { %604 = vmatmul.mubr.msk.bf16.vlgmr.msra.gmra.mxu0 %vm288_vm2, %v286_v8 }
  0x12   : > { %610 = vmatmul.mubr.msk.bf16.vlgmr.msra.gmra.mxu1 %vm288_vm2, %v363_v9 }
  0xd1   : > { %v330_v10 = vpop.f32.mrf.mxu0 }
  0xd2   : > { %v405_v11 = vpop.f32.mrf.mxu1  ;;  %337 = vst.msk [vmem:[%s270_s10] sm:$0xff] %vm288_vm2, %v330_v10  ;;  %v350_v17 = vmul.f32 %v330_v10, %v330_v10  ;;  %v339_v23 = vsel %vm288_vm2, %v330_v10, 0.0 }
  0xd3   : > { %412 = vst.msk [vmem:[%s278_s13] sm:$0xff] %vm411_vm3, %v405_v11  ;;  %v413_v12 = vsel %vm411_vm3, %v405_v11, 0.0  ;;  %v422_v13 = vmul.f32 %v405_v11, %v405_v11  ;;  %v605_v15 = vpop.f32.mrf.mxu0 }
  0xd4   : > { %v414_v14 = vrot.slane %v413_v12, 4  ;;  %v611_v16 = vpop.f32.mrf.mxu1  ;;  %v352_v31 = vsel %vm288_vm2, %v350_v17, 0.0 }
  0xd5   : > { %v423_v18 = vsel %vm411_vm3, %v422_v13, 0.0  ;;  %v333_v21 = vpop.f32.mrf.mxu0 }
  0xd6   : > { %v415_v19 = vadd.f32 %v414_v14, %v413_v12  ;;  %v424_v20 = vrot.slane %v423_v18, 4  ;;  %v408_v22 = vpop.f32.mrf.mxu1  ;;  %338 = vst.msk [vmem:[%s270_s10 + $0x8] sm:$0xff] %vm288_vm2, %v333_v21  ;;  %v340_v24 = vsel %vm288_vm2, %v333_v21, 0.0  ;;  %v351_v25 = vmul.f32 %v333_v21, %v333_v21 }
  0xd7   : > { %v341_v28 = vadd.f32 %v340_v24, %v339_v23  ;;  %v606_v29 = vpop.f32.mrf.mxu0 }
  0xd8   : > { %v416_v26 = vrot.slane %v415_v19, 2  ;;  %v425_v27 = vadd.f32 %v424_v20, %v423_v18  ;;  %v612_v30 = vpop.f32.mrf.mxu1  ;;  %v353_v32 = vsel %vm288_vm2, %v351_v25, 0.0 }
  0xd9   : > { %v342_v35 = vrot.slane %v341_v28, 4  ;;  %v354_v36 = vadd.f32 %v353_v32, %v352_v31 }
  0xda   : > { %v417_v33 = vadd.f32 %v416_v26, %v415_v19  ;;  %v426_v34 = vrot.slane %v425_v27, 2 }
  0xdb   : > { %v343_v39 = vadd.f32 %v342_v35, %v341_v28  ;;  %v355_v40 = vrot.slane %v354_v36, 4 }
  0xdc   : > { %v418_v37 = vrot.slane %v417_v33, 1  ;;  %v427_v38 = vadd.f32 %v426_v34, %v425_v27 }
  0xdd   : > { %v344_v43 = vrot.slane %v343_v39, 2  ;;  %v356_v44 = vadd.f32 %v355_v40, %v354_v36 }
  0xde   : > { %v419_v41 = vadd.f32 %v418_v37, %v417_v33  ;;  %v428_v42 = vrot.slane %v427_v38, 1 }
  0xdf   : > { %v345_v46 = vadd.f32 %v344_v43, %v343_v39  ;;  %v357_v47 = vrot.slane %v356_v44, 2 }
  0xe0   : > { %421 = vst.msk [vmem:[%s282_s17] sm:$0x1] %vm420_vm4, %v419_v41  ;;  %v429_v45 = vadd.f32 %v428_v42, %v427_v38 }
  0xe1   : > { %v346_v48 = vrot.slane %v345_v46, 1  ;;  %v358_v49 = vadd.f32 %v357_v47, %v356_v44 }
  0xe2   : > { %430 = vst.msk [vmem:[%s282_s17 + $0x1] sm:$0x1] %vm420_vm4, %v429_v45 }
  0xe3   : > { %v347_v50 = vadd.f32 %v346_v48, %v345_v46  ;;  %v359_v51 = vrot.slane %v358_v49, 1 }
  0xe5   : > { %349 = vst.msk [vmem:[%s274_s20] sm:$0x1] %vm348_vm5, %v347_v50  ;;  %v360_v52 = vadd.f32 %v359_v51, %v358_v49 }
  0xe7   : > { %361 = vst.msk [vmem:[%s274_s20 + $0x1] sm:$0x1] %vm348_vm5, %v360_v52 }
  0xe8 PF: > { %s17_s21 = sadd.s32 1, %s629_s21  }
  0xe9   : > { %p14_p4 = scmp.ge.s32.totalorder %s17_s21, 4  }
  0xeb   :  { %16 = sbr.rel (!%p14_p4) target bundleno = 1 (0x1), region = 98 }

// kernel: res_layer_pallas.9
= control target key start
LH: loop header
LB: loop body
LE: loop exit
PB: predicated region body
PF: predicated region fallthrough
CT: control target
= control target key end

     0   :  { %s475_s18 = smov 0   ;;  %s508_s0 = inlined_call_operand.vmem [shape: f32[2,8,4], index: 0, kind: input, shape index: {}]   ;;  %s509_s1 = inlined_call_operand.vmem [shape: f32[1,4], index: 1, kind: input, shape index: {}]   ;;  %s510_s2 = inlined_call_operand.vmem [shape: f32[1,4], index: 2, kind: input, shape index: {}]   ;;  %s511_s3 = inlined_call_operand.vmem [shape: bf16[4,16], index: 3, kind: input, shape index: {}]   ;;  %s512_s4 = inlined_call_operand.vmem [shape: f32[2,8,16], index: 4, kind: output, shape index: {0}]   ;;  %s513_s5 = inlined_call_operand.vmem [shape: f32[2,2,16], index: 5, kind: output, shape index: {1}]  }
   0x1 LB: > { %s404_s19 = sadd.s32 4294967295, %s441_s18   ;;  %p408_p0 = scmp.ge.s32.totalorder %s441_s18, 1  ;;  %s441_s18 = sphi %s475_s18, %s16_s18  }
   0x2   : > { %p189_p1 = scmp.lt.s32.totalorder %s441_s18, 3 }
   0x4   : > { %p190_p2 = pnand %p408_p0, %p189_p1 }
   0x5   : > { %p219_p3 = scmp.lt.s32.totalorder (!%p190_p2), %s404_s19, 1 }
   0x6   : > { %193 = sbr.rel (%p190_p2) target bundleno = 232 (0xe8), region = 36 }
   0xb   : > { %v251_v0 = vld [vmem:[%s511_s3] sm:$0x3]  ;;  %vm256_vm0 = vcmask 1041408   ;;  %v443_v1 = vmov 0.0   ;;  %vm444_vm1 = vmmov 0   ;;  %s515_s19 = smov (!%p219_p3, %s404_s19), 1 }
   0xc   : > { %419 = vmatprep.subr.bf16.mxu0 %v443_v1  ;;  %v258_v2 = vsel %vm256_vm0, %v251_v0, 0  ;;  %421 = vmatprep.mubr.msk.bf16.mxu0 %vm444_vm1, %v443_v1  ;;  %s409_s22 = sshll.u32 %s515_s19, 3  ;;  %v412_v3 = vld [vmem:[%s509_s1] ss:$0 sm:$0xff]  ;;  %vm252_vm2 = vcmask 31744   ;;  %vm300_vm3 = vcmask 130048  }
   0xd   : > { %420 = vmatpush3.bf16.msra.mxu0 %v258_v2  ;;  %s222_s27 = scalar_lea.vmem %s508_s0, %s409_s22  ;;  %v413_v5 = vld [vmem:[%s510_s2] ss:$0 sm:$0xff]  ;;  %s226_s7 = scalar_lea.vmem %s512_s4, %s409_s22  ;;  %vm309_vm4 = vcmask 122880  }
   0xe   : > { %v232_v4 = vld [vmem:[%s222_s27] sm:$0xff]  ;;  %s411_s8 = sshll.u32 %s515_s19, 1 }
   0xf   : > { %v240_v6 = vmul.f32 %v412_v3, %v232_v4  ;;  %s230_s11 = scalar_lea.vmem %s513_s5, %s411_s8 }
  0x11   : > { %v248_v7 = vadd.f32 %v413_v5, %v240_v6 }
  0x13   : > { %v249_v8 = vmax.f32 %v248_v7, 0.0 }
  0x15   : > { %v250_v9 = vpack.c.bf16 %v249_v8, %v249_v8 }
  0x17   : > { %422 = vmatmul.mubr.msk.bf16.vlgmr.msra.gmra.mxu0 %vm252_vm2, %v250_v9 }
  0xd7   : > { %v294_v10 = vpop.f32.mrf.mxu0 }
  0xd8   : > { %301 = vst.msk [vmem:[%s226_s7] sm:$0xff] %vm300_vm3, %v294_v10  ;;  %v302_v11 = vsel %vm300_vm3, %v294_v10, 0.0  ;;  %v311_v12 = vmul.f32 %v294_v10, %v294_v10 }
  0xd9   : > { %v303_v13 = vrot.slane %v302_v11, 4  ;;  %v423_v14 = vpop.f32.mrf.mxu0 }
  0xda   : > { %v312_v15 = vsel %vm300_vm3, %v311_v12, 0.0 }
  0xdb   : > { %v304_v16 = vadd.f32 %v303_v13, %v302_v11  ;;  %v313_v17 = vrot.slane %v312_v15, 4  ;;  %v297_v18 = vpop.f32.mrf.mxu0 }
  0xdd   : > { %v305_v19 = vrot.slane %v304_v16, 2  ;;  %v314_v20 = vadd.f32 %v313_v17, %v312_v15  ;;  %v424_v21 = vpop.f32.mrf.mxu0 }
  0xdf   : > { %v306_v22 = vadd.f32 %v305_v19, %v304_v16  ;;  %v315_v23 = vrot.slane %v314_v20, 2 }
  0xe1   : > { %v307_v24 = vrot.slane %v306_v22, 1  ;;  %v316_v25 = vadd.f32 %v315_v23, %v314_v20 }
  0xe3   : > { %v308_v26 = vadd.f32 %v307_v24, %v306_v22  ;;  %v317_v27 = vrot.slane %v316_v25, 1 }
  0xe5   : > { %310 = vst.msk [vmem:[%s230_s11] sm:$0x1] %vm309_vm4, %v308_v26  ;;  %v318_v28 = vadd.f32 %v317_v27, %v316_v25 }
  0xe7   : > { %319 = vst.msk [vmem:[%s230_s11 + $0x1] sm:$0x1] %vm309_vm4, %v318_v28 }
  0xe8 PF: > { %s16_s18 = sadd.s32 1, %s441_s18  }
  0xe9   : > { %p13_p4 = scmp.ge.s32.totalorder %s16_s18, 4  }
  0xeb   :  { %15 = sbr.rel (!%p13_p4) target bundleno = 1 (0x1), region = 78 }

// kernel: res_layer_pallas.8
= control target key start
LH: loop header
LB: loop body
LE: loop exit
PB: predicated region body
PF: predicated region fallthrough
CT: control target
= control target key end

     0   :  { %s516_s18 = smov 0   ;;  %s559_s0 = inlined_call_operand.vmem [shape: f32[2,16,4], index: 0, kind: input, shape index: {}]   ;;  %s560_s1 = inlined_call_operand.vmem [shape: f32[1,4], index: 1, kind: input, shape index: {}]   ;;  %s561_s2 = inlined_call_operand.vmem [shape: f32[1,4], index: 2, kind: input, shape index: {}]   ;;  %s562_s3 = inlined_call_operand.vmem [shape: bf16[12,4], index: 3, kind: input, shape index: {}]   ;;  %s563_s4 = inlined_call_operand.vmem [shape: f32[2,8,4], index: 4, kind: output, shape index: {0}]   ;;  %s564_s5 = inlined_call_operand.vmem [shape: f32[2,2,4], index: 5, kind: output, shape index: {1}]  }
   0x1 LB: > { %s437_s19 = sadd.s32 4294967295, %s480_s18   ;;  %p441_p0 = scmp.ge.s32.totalorder %s480_s18, 1  ;;  %s480_s18 = sphi %s516_s18, %s16_s18  }
   0x2   : > { %p190_p1 = scmp.lt.s32.totalorder %s480_s18, 3 }
   0x4   : > { %p191_p2 = pnand %p441_p0, %p190_p1 }
   0x5   : > { %p221_p3 = scmp.lt.s32.totalorder (!%p191_p2), %s437_s19, 1  ;;  %s484_s30 = smov (!%p191_p2), 4  }
   0x6   : > { %194 = sbr.rel (%p191_p2) target bundleno = 360 (0x168), region = 36  ;;  %s485_s6 = smov (!%p191_p2), 8  }
   0xb   : > { %vm257_vm0 = vcmask 24576   ;;  %s566_s19 = smov (!%p221_p3, %s437_s19), 1  ;;  %v482_v0 = vmov 0.0   ;;  %v446_v1 = vld [vmem:[%s560_s1] ss:$0 sm:$0xff]  ;;  %vm260_vm1 = vcmask 31744  }
   0xc   : > { %258 = vst.msk [vmem:[#allocation2] sm:$0x1] %vm257_vm0, %v482_v0  ;;  %455 = vmatprep.subr.bf16.mxu0 %v482_v0  ;;  %s452_s20 = sshll.u32 %s566_s19, 4  ;;  %v447_v4 = vld [vmem:[%s561_s2] ss:$0 sm:$0xff]  ;;  %vm291_vm2 = vcmask 1045504  }
   0xd   : > { %s225_s25 = scalar_lea.vmem %s559_s0, %s452_s20  ;;  %v473_v9 = vld [vmem:[%s562_s3] sm:$0x3f]   ;;  %vm483_vm3 = vmmov 0   ;;  %vm277_vm4 = vcmask 64512   ;;  %vm287_vm5 = vcmask 97280   ;;  %s444_s7 = sshll.u32 %s566_s19, 3 }
   0xe   : > { %v235_v2 = vld [vmem:[%s225_s25] sm:$0xff]  ;;  %v236_v3 = vld [vmem:[%s225_s25 + $0x8] sm:$0xff]  ;;  %v293_v12 = vsel %vm291_vm2, %v473_v9, 0  ;;  %457 = vmatprep.mubr.msk.bf16.mxu0 %vm483_vm3, %v482_v0  ;;  %s229_s10 = scalar_lea.vmem %s563_s4, %s444_s7  ;;  %s445_s11 = sshll.u32 %s566_s19, 1 }
   0xf   : > { %v244_v5 = vmul.f32 %v446_v1, %v235_v2  ;;  %v245_v6 = vmul.f32 %v446_v1, %v236_v3  ;;  %456 = vmatpush3.bf16.msra.mxu0 %v293_v12  ;;  %s233_s14 = scalar_lea.vmem %s564_s5, %s445_s11 }
  0x11   : > { %v253_v7 = vadd.f32 %v447_v4, %v244_v5  ;;  %v254_v8 = vadd.f32 %v447_v4, %v245_v6 }
  0x13   : > { %v255_v10 = vmax.f32 %v253_v7, 0.0  ;;  %v256_v11 = vmax.f32 %v254_v8, 0.0 }
  0x15   : > { %261 = vst.msk [vmem:[#allocation2 + $0x1] sm:$0xff] %vm260_vm1, %v255_v10  ;;  %262 = vst.msk [vmem:[#allocation2 + $0x9] sm:$0xff] %vm260_vm1, %v256_v11 }
  0x1c   : > { %v265_v13 = vld [vmem:[#allocation2 + $0x1] ss:$2 sm:$0xff]  ;;  %v267_v14 = vld [vmem:[#allocation2 + $0x2] ss:$2 sm:$0xff] }
  0x1d   : > { %269 = vrot.lane.b32.xlu0 %v265_v13, %s484_s30  ;;  %v263_v16 = vld [vmem:[#allocation2] ss:$2 sm:$0xff] }
  0x21   : > { %273 = vrot.lane.b32.xlu0 %v267_v14, %s485_s6 }
  0x8f   : > { %v270_v15 = vpop.permute.xlu0 %269 }
  0x90   : > { %v276_v17 = vsel %vm260_vm1, %v263_v16, %v270_v15 }
  0x93   : > { %v274_v18 = vpop.permute.xlu0 %273 }
  0x94   : > { %v278_v19 = vsel %vm277_vm4, %v276_v17, %v274_v18 }
  0x95   : > { %v279_v20 = vpack.c.bf16 %v278_v19, %v278_v19 }
  0x97   : > { %458 = vmatmul.mubr.msk.bf16.vlgmr.msra.gmra.mxu0 %vm287_vm5, %v279_v20 }
 0x157   : > { %v329_v21 = vpop.f32.mrf.mxu0 }
 0x158   : > { %335 = vst.msk [vmem:[%s229_s10] sm:$0xff] %vm260_vm1, %v329_v21  ;;  %v336_v22 = vsel %vm260_vm1, %v329_v21, 0.0  ;;  %v344_v23 = vmul.f32 %v329_v21, %v329_v21 }
 0x159   : > { %v337_v24 = vrot.slane %v336_v22, 4  ;;  %v459_v25 = vpop.f32.mrf.mxu0 }
 0x15a   : > { %v345_v26 = vsel %vm260_vm1, %v344_v23, 0.0 }
 0x15b   : > { %v338_v27 = vadd.f32 %v337_v24, %v336_v22  ;;  %v346_v28 = vrot.slane %v345_v26, 4  ;;  %v332_v29 = vpop.f32.mrf.mxu0 }
 0x15d   : > { %v339_v30 = vrot.slane %v338_v27, 2  ;;  %v347_v31 = vadd.f32 %v346_v28, %v345_v26  ;;  %v460_v32 = vpop.f32.mrf.mxu0 }
 0x15f   : > { %v340_v33 = vadd.f32 %v339_v30, %v338_v27  ;;  %v348_v34 = vrot.slane %v347_v31, 2 }
 0x161   : > { %v341_v35 = vrot.slane %v340_v33, 1  ;;  %v349_v36 = vadd.f32 %v348_v34, %v347_v31 }
 0x163   : > { %v342_v37 = vadd.f32 %v341_v35, %v340_v33  ;;  %v350_v38 = vrot.slane %v349_v36, 1 }
 0x165   : > { %343 = vst.msk [vmem:[%s233_s14] sm:$0x1] %vm257_vm0, %v342_v37  ;;  %v351_v39 = vadd.f32 %v350_v38, %v349_v36 }
 0x167   : > { %352 = vst.msk [vmem:[%s233_s14 + $0x1] sm:$0x1] %vm257_vm0, %v351_v39 }
 0x168 PF: > { %s16_s18 = sadd.s32 1, %s480_s18  }
 0x169   : > { %p13_p4 = scmp.ge.s32.totalorder %s16_s18, 4  }
 0x16b   :  { %15 = sbr.rel (!%p13_p4) target bundleno = 1 (0x1), region = 80 }

// kernel: res_layer_pallas.10
= control target key start
LH: loop header
LB: loop body
LE: loop exit
PB: predicated region body
PF: predicated region fallthrough
CT: control target
= control target key end

     0   :  { %s701_s30 = smov 0   ;;  %s746_s0 = inlined_call_operand.vmem [shape: f32[2,8,16], index: 0, kind: input, shape index: {}]   ;;  %s747_s1 = inlined_call_operand.vmem [shape: f32[1,16], index: 1, kind: input, shape index: {}]   ;;  %s748_s2 = inlined_call_operand.vmem [shape: f32[1,16], index: 2, kind: input, shape index: {}]   ;;  %s749_s3 = inlined_call_operand.vmem [shape: f32[2,8,16], index: 3, kind: input, shape index: {}]   ;;  %s750_s4 = inlined_call_operand.vmem [shape: f32[1,16], index: 4, kind: input, shape index: {}]   ;;  %s751_s5 = inlined_call_operand.vmem [shape: f32[1,16], index: 5, kind: input, shape index: {}]   ;;  %s752_s6 = inlined_call_operand.vmem [shape: bf16[16,4], index: 6, kind: input, shape index: {}]   ;;  %s753_s7 = inlined_call_operand.vmem [shape: f32[2,8,16], index: 7, kind: output, shape index: {0}]   ;;  %s754_s8 = inlined_call_operand.vmem [shape: f32[2,8,4], index: 8, kind: output, shape index: {1}]   ;;  %s755_s9 = inlined_call_operand.vmem [shape: f32[2,2,4], index: 9, kind: output, shape index: {2}]  }
   0x1 LB: > { %s604_s10 = sadd.s32 4294967295, %s647_s30   ;;  %p608_p0 = scmp.ge.s32.totalorder %s647_s30, 1  ;;  %s647_s30 = sphi %s701_s30, %s20_s30  }
   0x2   : > { %p300_p1 = scmp.lt.s32.totalorder %s647_s30, 3 }
   0x4   : > { %p301_p2 = pnand %p608_p0, %p300_p1 }
   0x5   : > { %p346_p3 = scmp.lt.s32.totalorder (!%p301_p2), %s604_s10, 1 }
   0x6   : > { %304 = sbr.rel (%p301_p2) target bundleno = 236 (0xec), region = 48 }
   0xb   : > { %v640_v0 = vld [vmem:[%s752_s6] sm:$0xff]   ;;  %v649_v1 = vmov 0.0   ;;  %vm650_vm0 = vmmov 0   ;;  %s757_s10 = smov (!%p346_p3, %s604_s10), 1  ;;  %vm403_vm1 = vcmask 130048   ;;  %vm457_vm2 = vcmask 31744  }
   0xc   : > { %624 = vmatprep.subr.bf16.mxu0 %v649_v1  ;;  %626 = vmatprep.mubr.msk.bf16.mxu0 %vm650_vm0, %v649_v1  ;;  %s609_s13 = sshll.u32 %s757_s10, 3  ;;  %v614_v2 = vld [vmem:[%s747_s1] ss:$0 sm:$0xff]  ;;  %s613_s16 = sshll.u32 %s757_s10, 1  ;;  %vm466_vm3 = vcmask 24576  }
   0xd   : > { %625 = vmatpush3.bf16.msra.mxu0 %v640_v0  ;;  %v616_v3 = vld [vmem:[%s750_s4] ss:$0 sm:$0xff]  ;;  %s349_s20 = scalar_lea.vmem %s746_s0, %s609_s13  ;;  %s353_s23 = scalar_lea.vmem %s749_s3, %s609_s13 }
   0xe   : > { %v615_v4 = vld [vmem:[%s748_s2] ss:$0 sm:$0xff]  ;;  %s357_s11 = scalar_lea.vmem %s753_s7, %s609_s13  ;;  %s361_s15 = scalar_lea.vmem %s754_s8, %s609_s13 }
   0xf   : > { %v367_v5 = vld [vmem:[%s349_s20] sm:$0xff]  ;;  %s365_s18 = scalar_lea.vmem %s755_s9, %s613_s16 }
  0x10   : > { %v384_v6 = vld [vmem:[%s353_s23] sm:$0xff]  ;;  %v375_v8 = vmul.f32 %v614_v2, %v367_v5 }
  0x11   : > { %v617_v7 = vld [vmem:[%s751_s5] ss:$0 sm:$0xff]  ;;  %v392_v9 = vmul.f32 %v616_v3, %v384_v6 }
  0x12   : > { %v383_v10 = vadd.f32 %v615_v4, %v375_v8 }
  0x13   : > { %v400_v11 = vadd.f32 %v617_v7, %v392_v9 }
  0x15   : > { %v401_v12 = vadd.f32 %v400_v11, %v383_v10 }
  0x17   : > { %v402_v13 = vmax.f32 %v401_v12, 0.0 }
  0x19   : > { %404 = vst.msk [vmem:[%s357_s11] sm:$0xff] %vm403_vm1, %v402_v13  ;;  %v405_v14 = vpack.c.bf16 %v402_v13, %v402_v13 }
  0x1b   : > { %627 = vmatmul.mubr.msk.bf16.vlgmr.msra.gmra.mxu0 %vm403_vm1, %v405_v14 }
  0xdb   : > { %v451_v15 = vpop.f32.mrf.mxu0 }
  0xdc   : > { %458 = vst.msk [vmem:[%s361_s15] sm:$0xff] %vm457_vm2, %v451_v15  ;;  %v459_v16 = vsel %vm457_vm2, %v451_v15, 0.0  ;;  %v468_v17 = vmul.f32 %v451_v15, %v451_v15 }
  0xdd   : > { %v460_v18 = vrot.slane %v459_v16, 4  ;;  %v628_v19 = vpop.f32.mrf.mxu0 }
  0xde   : > { %v469_v20 = vsel %vm457_vm2, %v468_v17, 0.0 }
  0xdf   : > { %v461_v21 = vadd.f32 %v460_v18, %v459_v16  ;;  %v470_v22 = vrot.slane %v469_v20, 4  ;;  %v454_v23 = vpop.f32.mrf.mxu0 }
  0xe1   : > { %v462_v24 = vrot.slane %v461_v21, 2  ;;  %v471_v25 = vadd.f32 %v470_v22, %v469_v20  ;;  %v629_v26 = vpop.f32.mrf.mxu0 }
  0xe3   : > { %v463_v27 = vadd.f32 %v462_v24, %v461_v21  ;;  %v472_v28 = vrot.slane %v471_v25, 2 }
  0xe5   : > { %v464_v29 = vrot.slane %v463_v27, 1  ;;  %v473_v30 = vadd.f32 %v472_v28, %v471_v25 }
  0xe7   : > { %v465_v31 = vadd.f32 %v464_v29, %v463_v27  ;;  %v474_v32 = vrot.slane %v473_v30, 1 }
  0xe9   : > { %467 = vst.msk [vmem:[%s365_s18] sm:$0x1] %vm466_vm3, %v465_v31  ;;  %v475_v33 = vadd.f32 %v474_v32, %v473_v30 }
  0xeb   : > { %476 = vst.msk [vmem:[%s365_s18 + $0x1] sm:$0x1] %vm466_vm3, %v475_v33 }
  0xec PF: > { %s20_s30 = sadd.s32 1, %s647_s30  }
  0xed   : > { %p17_p4 = scmp.ge.s32.totalorder %s20_s30, 4  }
  0xef   :  { %19 = sbr.rel (!%p17_p4) target bundleno = 1 (0x1), region = 105 }

// kernel: res_layer_pallas.11
= control target key start
LH: loop header
LB: loop body
LE: loop exit
PB: predicated region body
PF: predicated region fallthrough
CT: control target
= control target key end

     0   :  { %s504_s18 = smov 0   ;;  %s550_s0 = inlined_call_operand.vmem [shape: f32[2,8,4], index: 0, kind: input, shape index: {}]   ;;  %s551_s1 = inlined_call_operand.vmem [shape: f32[1,4], index: 1, kind: input, shape index: {}]   ;;  %s552_s2 = inlined_call_operand.vmem [shape: f32[1,4], index: 2, kind: input, shape index: {}]   ;;  %s553_s3 = inlined_call_operand.vmem [shape: bf16[12,4], index: 3, kind: input, shape index: {}]   ;;  %s554_s4 = inlined_call_operand.vmem [shape: f32[2,8,4], index: 4, kind: output, shape index: {0}]   ;;  %s555_s5 = inlined_call_operand.vmem [shape: f32[2,2,4], index: 5, kind: output, shape index: {1}]  }
   0x1 LB: > { %s427_s19 = sadd.s32 4294967295, %s468_s18   ;;  %p431_p0 = scmp.ge.s32.totalorder %s468_s18, 1  ;;  %s468_s18 = sphi %s504_s18, %s16_s18  }
   0x2   : > { %p189_p1 = scmp.lt.s32.totalorder %s468_s18, 3 }
   0x4   : > { %p190_p2 = pnand %p431_p0, %p189_p1 }
   0x5   : > { %p219_p3 = scmp.lt.s32.totalorder (!%p190_p2), %s427_s19, 1  ;;  %s472_s30 = smov (!%p190_p2), 4  }
   0x6   : > { %193 = sbr.rel (%p190_p2) target bundleno = 360 (0x168), region = 36  ;;  %s473_s6 = smov (!%p190_p2), 8  }
   0xb   : > { %vm250_vm0 = vcmask 24576   ;;  %s557_s19 = smov (!%p219_p3, %s427_s19), 1  ;;  %v470_v0 = vmov 0.0   ;;  %v435_v1 = vld [vmem:[%s551_s1] ss:$0 sm:$0xff]  ;;  %vm253_vm1 = vcmask 31744  }
   0xc   : > { %252 = vst.msk [vmem:[#allocation2 + $0x9] sm:$0x1] %vm250_vm0, %v470_v0  ;;  %251 = vst.msk [vmem:[#allocation2] sm:$0x1] %vm250_vm0, %v470_v0  ;;  %443 = vmatprep.subr.bf16.mxu0 %v470_v0  ;;  %s432_s20 = sshll.u32 %s557_s19, 3  ;;  %vm281_vm2 = vcmask 1045504  }
   0xd   : > { %s222_s25 = scalar_lea.vmem %s550_s0, %s432_s20  ;;  %v436_v3 = vld [vmem:[%s552_s2] ss:$0 sm:$0xff]  ;;  %vm471_vm3 = vmmov 0   ;;  %vm267_vm4 = vcmask 64512   ;;  %vm277_vm5 = vcmask 97280   ;;  %s226_s9 = scalar_lea.vmem %s554_s4, %s432_s20 }
   0xe   : > { %v232_v2 = vld [vmem:[%s222_s25] sm:$0xff]  ;;  %445 = vmatprep.mubr.msk.bf16.mxu0 %vm471_vm3, %v470_v0  ;;  %s434_s10 = sshll.u32 %s557_s19, 1 }
   0xf   : > { %v240_v4 = vmul.f32 %v435_v1, %v232_v2  ;;  %v461_v6 = vld [vmem:[%s553_s3] sm:$0x3f]   ;;  %s230_s13 = scalar_lea.vmem %s555_s5, %s434_s10 }
  0x10   : > { %v283_v8 = vsel %vm281_vm2, %v461_v6, 0 }
  0x11   : > { %v248_v5 = vadd.f32 %v436_v3, %v240_v4  ;;  %444 = vmatpush3.bf16.msra.mxu0 %v283_v8 }
  0x13   : > { %v249_v7 = vmax.f32 %v248_v5, 0.0 }
  0x15   : > { %254 = vst.msk [vmem:[#allocation2 + $0x1] sm:$0xff] %vm253_vm1, %v249_v7 }
  0x1c   : > { %v256_v9 = vld [vmem:[#allocation2 + $0x1] sm:$0xff] }
  0x1d   : > { %259 = vrot.lane.b32.xlu0 %v256_v9, %s472_s30  ;;  %v257_v10 = vld [vmem:[#allocation2 + $0x2] sm:$0xff] }
  0x1e   : > { %v255_v12 = vld [vmem:[#allocation2] sm:$0xff] }
  0x21   : > { %263 = vrot.lane.b32.xlu0 %v257_v10, %s473_s6 }
  0x8f   : > { %v260_v11 = vpop.permute.xlu0 %259 }
  0x90   : > { %v266_v13 = vsel %vm253_vm1, %v255_v12, %v260_v11 }
  0x93   : > { %v264_v14 = vpop.permute.xlu0 %263 }
  0x94   : > { %v268_v15 = vsel %vm267_vm4, %v266_v13, %v264_v14 }
  0x95   : > { %v269_v16 = vpack.c.bf16 %v268_v15, %v268_v15 }
  0x97   : > { %446 = vmatmul.mubr.msk.bf16.vlgmr.msra.gmra.mxu0 %vm277_vm5, %v269_v16 }
 0x157   : > { %v319_v17 = vpop.f32.mrf.mxu0 }
 0x158   : > { %325 = vst.msk [vmem:[%s226_s9] sm:$0xff] %vm253_vm1, %v319_v17  ;;  %v326_v18 = vsel %vm253_vm1, %v319_v17, 0.0  ;;  %v334_v19 = vmul.f32 %v319_v17, %v319_v17 }
 0x159   : > { %v327_v20 = vrot.slane %v326_v18, 4  ;;  %v447_v21 = vpop.f32.mrf.mxu0 }
 0x15a   : > { %v335_v22 = vsel %vm253_vm1, %v334_v19, 0.0 }
 0x15b   : > { %v328_v23 = vadd.f32 %v327_v20, %v326_v18  ;;  %v336_v24 = vrot.slane %v335_v22, 4  ;;  %v322_v25 = vpop.f32.mrf.mxu0 }
 0x15d   : > { %v329_v26 = vrot.slane %v328_v23, 2  ;;  %v337_v27 = vadd.f32 %v336_v24, %v335_v22  ;;  %v448_v28 = vpop.f32.mrf.mxu0 }
 0x15f   : > { %v330_v29 = vadd.f32 %v329_v26, %v328_v23  ;;  %v338_v30 = vrot.slane %v337_v27, 2 }
 0x161   : > { %v331_v31 = vrot.slane %v330_v29, 1  ;;  %v339_v32 = vadd.f32 %v338_v30, %v337_v27 }
 0x163   : > { %v332_v33 = vadd.f32 %v331_v31, %v330_v29  ;;  %v340_v34 = vrot.slane %v339_v32, 1 }
 0x165   : > { %333 = vst.msk [vmem:[%s230_s13] sm:$0x1] %vm250_vm0, %v332_v33  ;;  %v341_v35 = vadd.f32 %v340_v34, %v339_v32 }
 0x167   : > { %342 = vst.msk [vmem:[%s230_s13 + $0x1] sm:$0x1] %vm250_vm0, %v341_v35 }
 0x168 PF: > { %s16_s18 = sadd.s32 1, %s468_s18  }
 0x169   : > { %p13_p4 = scmp.ge.s32.totalorder %s16_s18, 4  }
 0x16b   :  { %15 = sbr.rel (!%p13_p4) target bundleno = 1 (0x1), region = 78 }

// kernel: res_layer_pallas.13
= control target key start
LH: loop header
LB: loop body
LE: loop exit
PB: predicated region body
PF: predicated region fallthrough
CT: control target
= control target key end

     0   :  { %9 = vsyncpa [#allocation3], 0  ;;  %s553_s0 = inlined_call_operand.vmem [shape: f32[2,8,16], index: 0, kind: input, shape index: {}]   ;;  %s554_s1 = inlined_call_operand.vmem [shape: f32[1,16], index: 1, kind: input, shape index: {}]   ;;  %s555_s2 = inlined_call_operand.vmem [shape: f32[1,16], index: 2, kind: input, shape index: {}]   ;;  %s556_s3 = inlined_call_operand.vmem [shape: f32[2,8,16], index: 3, kind: input, shape index: {}]   ;;  %s557_s4 = inlined_call_operand.hbm [shape: f32[2,8,16], index: 4, kind: output, shape index: {}]  }
   0x1   :  { %11 = vsyncpa [#allocation3 + $0x1], 0  ;;  %s457_s15 = smov 0   ;;  %s459_s16 = smov 0  }
   0x2   :  { %s461_s17 = smov 0   ;;  %s463_s18 = smov 0  }
   0x3 LB: > { %s478_s19 = sadd.s32 4294967295, %s429_s18   ;;  %s317_s20 = sadd.s32 4294967294, %s429_s18   ;;  %s429_s18 = sphi %s463_s18, %s563_s18   ;;  %s425_s17 = sphi %s461_s17, %s562_s17   ;;  %s421_s16 = sphi %s459_s16, %s561_s16   ;;  %s417_s15 = sphi %s457_s15, %s560_s15  }
   0x4   : > { %s482_s21 = sadd.s32 1, %s429_s18   ;;  %s118_s22 = sadd.s32 1, %s425_s17 }
   0x5   : > { %s115_s23 = ssub.s32 %s429_s18, %s482_s21  ;;  %p128_p0 = scmp.ne.s32.totalorder %s425_s17, %s421_s16 }
   0x6   : > { %p116_p1 = scmp.eq.s32.totalorder %s115_s23, 0  ;;  %p129_p2 = scmp.eq.s32.totalorder %s478_s19, 1 }
   0x7   : > { %p134_p3 = scmp.ne.s32.totalorder %s421_s16, %s417_s15  ;;  %p135_p4 = scmp.eq.s32.totalorder %s317_s20, 1 }
   0x8   : > { %s493_s24 = scalar_select %p116_p1, %s425_s17, %s118_s22  }
   0x9   : > { %p495_p5 = por %p129_p2, %p128_p0  ;;  %p499_p6 = por %p135_p4, %p134_p3 }
   0xa   : > { %p320_p7 = scmp.ge.s32.totalorder %s429_s18, 1  ;;  %p173_p8 = scmp.lt.s32.totalorder %s429_s18, 3 }
   0xc   : > { %p174_p9 = pnand %p320_p7, %p173_p8 }
   0xd   : > { %p202_p10 = scmp.lt.s32.totalorder (!%p174_p9), %s478_s19, 1  ;;  %s199_s27 = sand.u32 (!%p174_p9), 1, %s421_s16  }
   0xe   : > { %177 = sbr.rel (%p174_p9) target bundleno = 45 (0x2d), region = 36  ;;  %s321_s29 = sshll.u32 (!%p174_p9), %s199_s27, 3 }
   0xf   : > { %s201_s20 = scalar_lea.vmem (!%p174_p9), [#allocation2], %s321_s29  ;;  %s327_s23 = sshll.u32 (!%p174_p9), %s478_s19, 7 }
  0x10   : > { %s246_s22 = sshll.u32 (!%p174_p9), %s201_s20, 4  ;;  %s233_s6 = scalar_lea.sflag (!%p174_p9), [#allocation3], %s199_s27  ;;  %s247_s22 = int_to_ptr.vmem [resolvable:$true] %s246_s22 }
  0x11   : > { %s369_s7 = scalar_lea.vmem (!%p174_p9), %s247_s22, 128  ;;  %s431_s8 = smov (!%p174_p9), [#allocation2]  }
  0x12   : > { %p370_p11 = scmp.ne.s32.totalorder (!%p174_p9), %s247_s22, %s369_s7 }
  0x13   : > { %s203_s28 = scalar_select %p202_p10, %s478_s19, 1  ;;  %v324_v0 = vld [vmem:[%s554_s1] ss:$0 sm:$0xff]  ;;  %vm230_vm0 = vcmask 130048  }
  0x14   : > { %v325_v2 = vld [vmem:[%s555_s2] ss:$0 sm:$0xff]  ;;  %p371_p12 = pnand %p370_p11, %p495_p5 }
  0x15   : > { %s322_s30 = sshll.u32 %s203_s28, 3 }
  0x16   : > { %s205_s9 = scalar_lea.vmem %s553_s0, %s322_s30  ;;  %s209_s12 = scalar_lea.vmem %s556_s3, %s322_s30 }
  0x17   : > { %v210_v1 = vld [vmem:[%s205_s9] sm:$0xff]  ;;  %s244_s30 = scalar_lea.hbm %s557_s4, %s327_s23  ;;  %p372_p13 = pneg %p371_p12 }
  0x18   : > { %v218_v3 = vmul.f32 %v324_v0, %v210_v1  ;;  %v227_v4 = vld [vmem:[%s209_s12] sm:$0xff]  ;;  %s373_s9 = sshll.u32 %s431_s8, 4  ;;  %s374_s9 = int_to_ptr.vmem [resolvable:$false] %s373_s9 }
  0x19   : > { %s375_s29 = scalar_lea.vmem %s374_s9, 256  ;;  %p376_p0 = scmp.lt.s32.totalorder %s247_s22, %s374_s9 }
  0x1a   : > { %v226_v5 = vadd.f32 %v325_v2, %v218_v3  ;;  %p377_p1 = scmp.lt.s32.totalorder %s375_s29, %s369_s7 }
  0x1c   : > { %v228_v6 = vadd.f32 %v227_v4, %v226_v5  ;;  %p378_p2 = por %p377_p1, %p376_p0 }
  0x1e   : > { %v229_v7 = vmax.f32 %v228_v6, 0.0  ;;  %p379_p3 = pnand %p378_p2, %p372_p13 }
  0x20   : > { %231 = vst.msk [vmem:[%s201_s20] sm:$0xff] %vm230_vm0, %v229_v7 }
  0x21   : > { %382 = shalt.err (!%p379_p3)
}
  0x22   : > { %s383_s19 = scalar_lea.hbm %s244_s30, 128  ;;  %s387_s11 = scalar_lea.hbm %s557_s4, 256 }
  0x23   : > { %p384_p4 = scmp.ne.s32.totalorder %s244_s30, %s383_s19  ;;  %p388_p9 = scmp.lt.s32.totalorder %s244_s30, %s557_s4 }
  0x24   : > { %p389_p10 = scmp.lt.s32.totalorder %s387_s11, %s383_s19 }
  0x25   : > { %p385_p7 = pnand %p384_p4, %p495_p5 }
  0x26   : > { %p390_p11 = por %p389_p10, %p388_p9 }
  0x27   : > { %p386_p8 = pneg %p385_p7 }
  0x29   : > { %p391_p12 = pnand %p390_p11, %p386_p8 }
  0x2b   : > { %394 = shalt.err (!%p391_p12)
}
  0x2c   : > { %330 = dma.vmem_to_hbm [thread:$0]  (%p495_p5), %s247_s22, 128, %s244_s30, %s233_s6  }
  0x2d PF: > { %p336_p13 = scmp.ge.s32.totalorder %s429_s18, 2  ;;  %s258_s14 = sand.u32 1, %s417_s15  }
  0x2e   : > { %s259_s20 = scalar_lea.sflag [#allocation3], %s258_s14 }
  0x2f   : > { %p333_p0 = pnand %p336_p13, %p499_p6 }
  0x31   : > { %p334_p1 = pneg %p333_p0 }
  0x33   : > { %412 = dma.done.wait (%p334_p1), %s259_s20, 128  }
  0x34   : > { %414 = vsyncadd (%p334_p1), %s259_s20, 4294967168  ;;  %p14_p2 = scmp.ge.s32.totalorder %s482_s21, 4   ;;  %s560_s15 = smov %s421_s16 }
  0x35   : > { %s561_s16 = smov %s425_s17  ;;  %s562_s17 = smov %s493_s24 }
  0x36   : > { %s563_s18 = smov %s482_s21  ;;  %16 = sbr.rel (!%p14_p2) target bundleno = 3 (0x3), region = 74 }
  0x3b   :  { %264 = vsyncpa [#allocation3], 1 }
  0x3c   :  { %266 = vsyncpa [#allocation3 + $0x1], 1 }

</bundles_post_ra>
